<compile_context>
chip_gen: v7x
topology: tpu7x:2x2x1
jax: 0.10.0
libtpu: 0.0.40
codegen_flags: <defaults>
</compile_context>

<pallas_src>
import numpy as np
import jax
import jax.numpy as jnp
from jax.experimental import pallas as pl
from jax.experimental.pallas import tpu as pltpu

# ---- small sizes consistent with the module's forward ----
B = 2
T = 4                      # forward hardcodes 4 repeated action/speed codes
C, HS, WS = 32, 4, 4       # per-frame feature map -> D_VIS = 512 (stand-in for 512*4*4=8192)
D_VIS = C * HS * WS
ACT_CHN = 8
SPD_CHN = 8
HID = 32                   # 4*HID = 128 -> lane-dense gate width
NUM_LAYERS = 2
CODER_HID = 64
CTRL_PAD = 8               # action/speed (B,3) zero-padded to 8 cols (aligned K)

# coder_pack row offsets (last dim = CODER_HID)
_AW1_OFF, _AB1_OFF, _SW1_OFF, _SB1_OFF = 0, 8, 16, 24
_CODER_ROWS = 32
# proj_pack row offsets (last dim = 4*HID = 128); all matmul operands 8-row aligned
_AW2_OFF, _SW2_OFF = 0, 64
_WHH0_OFF, _WIH1_OFF, _WHH1_OFF = 128, 160, 192
_B0_OFF, _B1_OFF = 224, 232
_PROJ_ROWS = 240


# -------------------- fused Pallas kernel --------------------

def fused_encoder_kernel(action_ref, speed_ref, vis_ref,
                         coder_ref, proj_ref, fc_b_ref,
                         wih0_hbm, fcw_hbm,
                         out_ref, hn_ref, cn_ref,
                         wih0_buf, fcw_buf, y_buf, dma_sem):
    f32 = jnp.float32
    Bk = action_ref.shape[0]
    TBk, Hk = y_buf.shape
    Tk = TBk // Bk

    # Kick off the big weight DMAs immediately; wih0 is awaited just before the
    # hoisted projection, fc_w only right before the output FC (latency hiding).
    wih0_cp = pltpu.make_async_copy(wih0_hbm, wih0_buf, dma_sem.at[0])
    fcw_cp = pltpu.make_async_copy(fcw_hbm, fcw_buf, dma_sem.at[1])
    wih0_cp.start()
    fcw_cp.start()

    # ---- static slices of the packed small parameters ----
    a_w1 = coder_ref[_AW1_OFF:_AW1_OFF + CTRL_PAD, :]
    a_b1 = coder_ref[_AB1_OFF:_AB1_OFF + 1, :]
    s_w1 = coder_ref[_SW1_OFF:_SW1_OFF + CTRL_PAD, :]
    s_b1 = coder_ref[_SB1_OFF:_SB1_OFF + 1, :]
    aw2 = proj_ref[_AW2_OFF:_AW2_OFF + CODER_HID, :]      # a_w2 @ wih0_act (scaled)
    sw2 = proj_ref[_SW2_OFF:_SW2_OFF + CODER_HID, :]      # s_w2 @ wih0_spd (scaled)
    whh0 = proj_ref[_WHH0_OFF:_WHH0_OFF + Hk, :]
    wih1 = proj_ref[_WIH1_OFF:_WIH1_OFF + Hk, :]
    whh1 = proj_ref[_WHH1_OFF:_WHH1_OFF + Hk, :]
    b0 = proj_ref[_B0_OFF:_B0_OFF + 1, :]
    b1 = proj_ref[_B1_OFF:_B1_OFF + 1, :]

    # ---- coder MLP hidden layers (2nd layers pre-composed into aw2/sw2/b0) ----
    a_h = jnp.maximum(jnp.dot(action_ref[...], a_w1, preferred_element_type=f32) + a_b1, 0.0)
    s_h = jnp.maximum(jnp.dot(speed_ref[...], s_w1, preferred_element_type=f32) + s_b1, 0.0)
    as_bias = (jnp.dot(a_h, aw2, preferred_element_type=f32)
               + jnp.dot(s_h, sw2, preferred_element_type=f32)
               + b0)                                            # (B, 4H), gate-scaled

    # ---- hoisted layer-0 input projection (bf16 MXU operands, f32 accumulate) ----
    wih0_cp.wait()
    g0_all = jnp.dot(vis_ref[...], wih0_buf[...], preferred_element_type=f32)   # (T*B, 4H)
    # Fold the time-invariant bias ONCE; (T, B, 4H) view keeps 128 on lanes.
    g0 = g0_all.reshape(Tk, Bk, 4 * Hk) + as_bias

    def cell(pre, c):
        # i/f/o columns of `pre` are pre-scaled by 0.5 at pack time, so one
        # full-width tanh gives sigmoid(i,f,o) = 0.5*(1+tanh(x/2)) and tanh(g).
        th = jnp.tanh(pre)
        sg = 0.5 * th + 0.5
        i = sg[:, 0:Hk]
        f = sg[:, Hk:2 * Hk]
        g = th[:, 2 * Hk:3 * Hk]
        o = sg[:, 3 * Hk:4 * Hk]
        c_new = f * c + i * g
        h_new = o * jnp.tanh(c_new)
        return h_new, c_new

    h0 = jnp.zeros((Bk, Hk), f32)
    c0 = jnp.zeros((Bk, Hk), f32)
    h1 = jnp.zeros((Bk, Hk), f32)
    c1 = jnp.zeros((Bk, Hk), f32)

    # Interleaved two-layer recurrence (T static & tiny -> fully unrolled).
    # Layer-1 step t depends only on h0_t and h1_{t-1}, so it can overlap
    # layer-0 step t+1 -- the dependent chain is ~T+1 cell stages, not 2T.
    for t in range(Tk):
        h0, c0 = cell(g0[t] + jnp.dot(h0, whh0, preferred_element_type=f32), c0)
        h1, c1 = cell(jnp.dot(h0, wih1, preferred_element_type=f32)
                      + jnp.dot(h1, whh1, preferred_element_type=f32) + b1, c1)
        y_buf[pl.ds(t * Bk, Bk), :] = h1          # off the dependent chain

    # Final states (tiny one-time writes).
    hn_ref[0, :, :] = h0
    hn_ref[1, :, :] = h1
    cn_ref[0, :, :] = c0
    cn_ref[1, :, :] = c1

    # ---- fused output FC: single lane-dense (T*B, D_VIS) store ----
    fcw_cp.wait()
    y_bf = y_buf[...].astype(fcw_buf.dtype)
    out_ref[...] = (jnp.dot(y_bf, fcw_buf[...], preferred_element_type=f32)
                    + fc_b_ref[...])


# -------------------- forward wrapper (single pallas_call) --------------------

def forward(embedding, action, speed, kp):
    Bv, Tv = embedding.shape[0], embedding.shape[1]
    vis = embedding.reshape(Bv, Tv, D_VIS)
    # time-major rows so each step is a contiguous row slice; bf16 MXU operand
    vis_tb = jnp.transpose(vis, (1, 0, 2)).reshape(Tv * Bv, D_VIS).astype(jnp.bfloat16)
    act_pad = jnp.pad(action, ((0, 0), (0, CTRL_PAD - action.shape[1])))
    spd_pad = jnp.pad(speed, ((0, 0), (0, CTRL_PAD - speed.shape[1])))

    def vmem():
        return pl.BlockSpec(memory_space=pltpu.MemorySpace.VMEM)

    out_tb, h_n, c_n = pl.pallas_call(
        fused_encoder_kernel,
        out_shape=(
            jax.ShapeDtypeStruct((Tv * Bv, D_VIS), jnp.float32),      # fc(y), time-major
            jax.ShapeDtypeStruct((NUM_LAYERS, Bv, HID), jnp.float32),  # h_n
            jax.ShapeDtypeStruct((NUM_LAYERS, Bv, HID), jnp.float32),  # c_n
        ),
        in_specs=[vmem(), vmem(), vmem(), vmem(), vmem(), vmem(),
                  pl.BlockSpec(memory_space=pl.ANY),     # wih0_vis: stays in HBM
                  pl.BlockSpec(memory_space=pl.ANY)],    # fc_w:     stays in HBM
        out_specs=(vmem(), vmem(), vmem()),
        scratch_shapes=[
            pltpu.VMEM((D_VIS, 4 * HID), jnp.bfloat16),  # wih0_vis landing buffer
            pltpu.VMEM((HID, D_VIS), jnp.bfloat16),      # fc_w landing buffer
            pltpu.VMEM((Tv * Bv, HID), jnp.float32),     # per-step LSTM outputs
            pltpu.SemaphoreType.DMA((2,)),
        ],
    )(act_pad, spd_pad, vis_tb,
      kp["coder_pack"], kp["proj_pack"], kp["fc_b"],
      kp["wih0_vis"], kp["fc_w"])

    # layout plumbing back to batch-major / original embedding shape (outside kernel)
    out = out_tb.reshape(Tv, Bv, D_VIS).transpose(1, 0, 2).reshape(embedding.shape)
    return out, (h_n, c_n)


forward_jit = jax.jit(forward)


# -------------------- parameters --------------------

def init_params(key):
    """Textbook (PyTorch-layout, already transposed to (in, out)) parameters."""
    def uniform(key, shape, fan_in):
        k = 1.0 / np.sqrt(fan_in)
        return jax.random.uniform(key, shape, jnp.float32, -k, k)

    keys = jax.random.split(key, 20)
    p = {}
    # action coder: Linear(3,64) -> ReLU -> Linear(64, ACT_CHN)
    p["a_w1"] = uniform(keys[0], (3, CODER_HID), 3)
    p["a_b1"] = uniform(keys[1], (1, CODER_HID), 3)
    p["a_w2"] = uniform(keys[2], (CODER_HID, ACT_CHN), CODER_HID)
    p["a_b2"] = uniform(keys[3], (1, ACT_CHN), CODER_HID)
    # speed coder
    p["s_w1"] = uniform(keys[4], (3, CODER_HID), 3)
    p["s_b1"] = uniform(keys[5], (1, CODER_HID), 3)
    p["s_w2"] = uniform(keys[6], (CODER_HID, SPD_CHN), CODER_HID)
    p["s_b2"] = uniform(keys[7], (1, SPD_CHN), CODER_HID)
    # LSTM layer 0: wih0 split along its input dim into [vis | action | speed]
    wih0_full = uniform(keys[8], (D_VIS + ACT_CHN + SPD_CHN, 4 * HID), HID)
    p["wih0_vis"] = wih0_full[:D_VIS, :]
    p["wih0_act"] = wih0_full[D_VIS:D_VIS + ACT_CHN, :]
    p["wih0_spd"] = wih0_full[D_VIS + ACT_CHN:, :]
    p["whh0"] = uniform(keys[9], (HID, 4 * HID), HID)
    p["b0"] = uniform(keys[10], (1, 4 * HID), HID) + uniform(keys[11], (1, 4 * HID), HID)
    # LSTM layer 1
    p["wih1"] = uniform(keys[12], (HID, 4 * HID), HID)
    p["whh1"] = uniform(keys[13], (HID, 4 * HID), HID)
    p["b1"] = uniform(keys[14], (1, 4 * HID), HID) + uniform(keys[15], (1, 4 * HID), HID)
    # output_fc: Linear(HID, C*HS*WS)
    p["fc_w"] = uniform(keys[16], (HID, D_VIS), HID)
    p["fc_b"] = uniform(keys[17], (1, D_VIS), HID)
    return p


def pack_params(p):
    """One-time prep: gate-scale i/f/o columns (sigmoid-via-tanh trick), compose the
    coder second layers with wih0_act/spd, pack small tensors, cast big MXU operands
    to bf16 (accumulation in the kernel stays f32)."""
    gs = jnp.concatenate([
        jnp.full((1, HID), 0.5, jnp.float32),   # i
        jnp.full((1, HID), 0.5, jnp.float32),   # f
        jnp.ones((1, HID), jnp.float32),        # g
        jnp.full((1, HID), 0.5, jnp.float32),   # o
    ], axis=1)

    wih0_act_s = p["wih0_act"] * gs
    wih0_spd_s = p["wih0_spd"] * gs
    aw2_eff = p["a_w2"] @ wih0_act_s                       # (64, 4H)
    sw2_eff = p["s_w2"] @ wih0_spd_s                       # (64, 4H)
    b0_eff = p["b0"] * gs + p["a_b2"] @ wih0_act_s + p["s_b2"] @ wih0_spd_s

    coder_pack = jnp.zeros((_CODER_ROWS, CODER_HID), jnp.float32)
    coder_pack = coder_pack.at[_AW1_OFF:_AW1_OFF + 3].set(p["a_w1"])
    coder_pack = coder_pack.at[_AB1_OFF:_AB1_OFF + 1].set(p["a_b1"])
    coder_pack = coder_pack.at[_SW1_OFF:_SW1_OFF + 3].set(p["s_w1"])
    coder_pack = coder_pack.at[_SB1_OFF:_SB1_OFF + 1].set(p["s_b1"])

    proj_pack = jnp.zeros((_PROJ_ROWS, 4 * HID), jnp.float32)
    proj_pack = proj_pack.at[_AW2_OFF:_AW2_OFF + CODER_HID].set(aw2_eff)
    proj_pack = proj_pack.at[_SW2_OFF:_SW2_OFF + CODER_HID].set(sw2_eff)
    proj_pack = proj_pack.at[_WHH0_OFF:_WHH0_OFF + HID].set(p["whh0"] * gs)
    proj_pack = proj_pack.at[_WIH1_OFF:_WIH1_OFF + HID].set(p["wih1"] * gs)
    proj_pack = proj_pack.at[_WHH1_OFF:_WHH1_OFF + HID].set(p["whh1"] * gs)
    proj_pack = proj_pack.at[_B0_OFF:_B0_OFF + 1].set(b0_eff)
    proj_pack = proj_pack.at[_B1_OFF:_B1_OFF + 1].set(p["b1"] * gs)

    return {
        "coder_pack": coder_pack,
        "proj_pack": proj_pack,
        "fc_b": p["fc_b"],
        # 0.5 gate-scale is a power of two -> exact in bf16
        "wih0_vis": (p["wih0_vis"] * gs).astype(jnp.bfloat16),
        "fc_w": p["fc_w"].astype(jnp.bfloat16),
    }


# -------------------- pure-JAX reference (textbook concat-based form) --------------------

def ref_forward(embedding, action, speed, p):
    def mlp(x, w1, b1, w2, b2):
        return jnp.maximum(x @ w1 + b1, 0.0) @ w2 + b2

    a = mlp(action, p["a_w1"], p["a_b1"], p["a_w2"], p["a_b2"])
    s = mlp(speed, p["s_w1"], p["s_b1"], p["s_w2"], p["s_b2"])
    a4 = jnp.broadcast_to(a[:, None, :], (B, 4, ACT_CHN))
    s4 = jnp.broadcast_to(s[:, None, :], (B, 4, SPD_CHN))
    vis = embedding.reshape(B, T, -1)
    x = jnp.concatenate([vis, a4, s4], axis=2)

    wih0 = jnp.concatenate([p["wih0_vis"], p["wih0_act"], p["wih0_spd"]], axis=0)

    def cell(x_t, h, c, wih, whh, b):
        g = x_t @ wih + h @ whh + b
        i = jax.nn.sigmoid(g[:, 0:HID])
        f = jax.nn.sigmoid(g[:, HID:2 * HID])
        gg = jnp.tanh(g[:, 2 * HID:3 * HID])
        o = jax.nn.sigmoid(g[:, 3 * HID:4 * HID])
        c = f * c + i * gg
        h = o * jnp.tanh(c)
        return h, c

    h0 = c0 = h1 = c1 = jnp.zeros((B, HID), jnp.float32)
    ys = []
    for t in range(T):
        h0, c0 = cell(x[:, t, :], h0, c0, wih0, p["whh0"], p["b0"])
        h1, c1 = cell(h0, h1, c1, p["wih1"], p["whh1"], p["b1"])
        ys.append(h1)
    y_seq = jnp.stack(ys, axis=1)
    h_n = jnp.stack([h0, h1], axis=0)
    c_n = jnp.stack([c0, c1], axis=0)
    y = y_seq.reshape(B * T, HID) @ p["fc_w"] + p["fc_b"]
    return y.reshape(embedding.shape), (h_n, c_n)


if __name__ == "__main__":
    key = jax.random.PRNGKey(0)
    kp_, ke, ka, ks = jax.random.split(key, 4)
    params = init_params(kp_)
    kparams = pack_params(params)   # one-time param prep, outside the jitted forward

    embedding = jax.random.normal(ke, (B, T, C, HS, WS), jnp.float32)
    action = jax.random.normal(ka, (B, 3), jnp.float32)
    speed = jax.random.normal(ks, (B, 3), jnp.float32)

    out, (h_n, c_n) = forward_jit(embedding, action, speed, kparams)
    jax.block_until_ready((out, h_n, c_n))

    ref_out, (ref_h, ref_c) = ref_forward(embedding, action, speed, params)
    # bf16 MXU operands (vis / wih0_vis / fc_w / y) vs the all-f32 reference -> ~1e-2-level tol
    np.testing.assert_allclose(np.asarray(out), np.asarray(ref_out), rtol=2e-2, atol=2e-2)
    np.testing.assert_allclose(np.asarray(h_n), np.asarray(ref_h), rtol=2e-2, atol=2e-2)
    np.testing.assert_allclose(np.asarray(c_n), np.asarray(ref_c), rtol=2e-2, atol=2e-2)

    assert out.shape == embedding.shape
    assert h_n.shape == (NUM_LAYERS, B, HID) and c_n.shape == (NUM_LAYERS, B, HID)
    print("KERNEL_OK")
</pallas_src>

<mosaic_0001>
module attributes {stable_mosaic.version = 11 : i64} {
  func.func @fused_encoder_kernel(%arg0: memref<2x8xf32, #tpu.memory_space<vmem>>, %arg1: memref<2x8xf32, #tpu.memory_space<vmem>>, %arg2: memref<8x512xbf16, #tpu.memory_space<vmem>>, %arg3: memref<32x64xf32, #tpu.memory_space<vmem>>, %arg4: memref<240x128xf32, #tpu.memory_space<vmem>>, %arg5: memref<1x512xf32, #tpu.memory_space<vmem>>, %arg6: memref<512x128xbf16, #tpu.memory_space<any>>, %arg7: memref<32x512xbf16, #tpu.memory_space<any>>, %arg8: memref<8x512xf32, #tpu.memory_space<vmem>>, %arg9: memref<2x2x32xf32, #tpu.memory_space<vmem>>, %arg10: memref<2x2x32xf32, #tpu.memory_space<vmem>>, %arg11: memref<512x128xbf16, #tpu.memory_space<vmem>>, %arg12: memref<32x512xbf16, #tpu.memory_space<vmem>>, %arg13: memref<8x32xf32, #tpu.memory_space<vmem>>, %arg14: memref<2x!tpu.dma_semaphore, #tpu.memory_space<semaphore_mem>>) attributes {dimension_semantics = [], scalar_prefetch = 0 : i64, scratch_operands = 4 : i64, tpu.core_type = #tpu.core_type<tc>} {
    %c0_i32 = arith.constant 0 : i32
    %0 = tpu.memref_slice %arg14[%c0_i32] : memref<2x!tpu.dma_semaphore, #tpu.memory_space<semaphore_mem>> -> memref<1x!tpu.dma_semaphore, #tpu.memory_space<semaphore_mem>>
    %1 = tpu.memref_squeeze %0 : memref<1x!tpu.dma_semaphore, #tpu.memory_space<semaphore_mem>> -> memref<!tpu.dma_semaphore, #tpu.memory_space<semaphore_mem>>
    tpu.enqueue_dma source(%arg6 : memref<512x128xbf16, #tpu.memory_space<any>>) target(%arg11 : memref<512x128xbf16, #tpu.memory_space<vmem>>) target_semaphore(%1 : memref<!tpu.dma_semaphore, #tpu.memory_space<semaphore_mem>>)
    %c1_i32 = arith.constant 1 : i32
    %2 = tpu.memref_slice %arg14[%c1_i32] : memref<2x!tpu.dma_semaphore, #tpu.memory_space<semaphore_mem>> -> memref<1x!tpu.dma_semaphore, #tpu.memory_space<semaphore_mem>>
    %3 = tpu.memref_squeeze %2 : memref<1x!tpu.dma_semaphore, #tpu.memory_space<semaphore_mem>> -> memref<!tpu.dma_semaphore, #tpu.memory_space<semaphore_mem>>
    tpu.enqueue_dma source(%arg7 : memref<32x512xbf16, #tpu.memory_space<any>>) target(%arg12 : memref<32x512xbf16, #tpu.memory_space<vmem>>) target_semaphore(%3 : memref<!tpu.dma_semaphore, #tpu.memory_space<semaphore_mem>>)
    %c0 = arith.constant 0 : index
    %c0_0 = arith.constant 0 : index
    %4 = vector.load %arg3[%c0, %c0_0] : memref<32x64xf32, #tpu.memory_space<vmem>>, vector<8x64xf32>
    %c8 = arith.constant 8 : index
    %c0_1 = arith.constant 0 : index
    %5 = vector.load %arg3[%c8, %c0_1] : memref<32x64xf32, #tpu.memory_space<vmem>>, vector<1x64xf32>
    %c16 = arith.constant 16 : index
    %c0_2 = arith.constant 0 : index
    %6 = vector.load %arg3[%c16, %c0_2] : memref<32x64xf32, #tpu.memory_space<vmem>>, vector<8x64xf32>
    %c24 = arith.constant 24 : index
    %c0_3 = arith.constant 0 : index
    %7 = vector.load %arg3[%c24, %c0_3] : memref<32x64xf32, #tpu.memory_space<vmem>>, vector<1x64xf32>
    %c0_4 = arith.constant 0 : index
    %c0_5 = arith.constant 0 : index
    %8 = vector.load %arg4[%c0_4, %c0_5] : memref<240x128xf32, #tpu.memory_space<vmem>>, vector<64x128xf32>
    %c64 = arith.constant 64 : index
    %c0_6 = arith.constant 0 : index
    %9 = vector.load %arg4[%c64, %c0_6] : memref<240x128xf32, #tpu.memory_space<vmem>>, vector<64x128xf32>
    %c128 = arith.constant 128 : index
    %c0_7 = arith.constant 0 : index
    %10 = vector.load %arg4[%c128, %c0_7] : memref<240x128xf32, #tpu.memory_space<vmem>>, vector<32x128xf32>
    %c160 = arith.constant 160 : index
    %c0_8 = arith.constant 0 : index
    %11 = vector.load %arg4[%c160, %c0_8] : memref<240x128xf32, #tpu.memory_space<vmem>>, vector<32x128xf32>
    %c192 = arith.constant 192 : index
    %c0_9 = arith.constant 0 : index
    %12 = vector.load %arg4[%c192, %c0_9] : memref<240x128xf32, #tpu.memory_space<vmem>>, vector<32x128xf32>
    %c224 = arith.constant 224 : index
    %c0_10 = arith.constant 0 : index
    %13 = vector.load %arg4[%c224, %c0_10] : memref<240x128xf32, #tpu.memory_space<vmem>>, vector<1x128xf32>
    %c232 = arith.constant 232 : index
    %c0_11 = arith.constant 0 : index
    %14 = vector.load %arg4[%c232, %c0_11] : memref<240x128xf32, #tpu.memory_space<vmem>>, vector<1x128xf32>
    %c0_12 = arith.constant 0 : index
    %c0_13 = arith.constant 0 : index
    %15 = vector.load %arg0[%c0_12, %c0_13] : memref<2x8xf32, #tpu.memory_space<vmem>>, vector<2x8xf32>
    %cst = arith.constant dense<0.000000e+00> : vector<2x64xf32>
    %16 = tpu.matmul %15, %4, %cst {dimension_numbers = #tpu.dot_dimension_numbers<[1], [0], [0], [1], [0, 0, 1, 1], [], []>} : vector<2x8xf32>, vector<8x64xf32>, vector<2x64xf32> -> vector<2x64xf32>
    %17 = vector.broadcast %5 : vector<1x64xf32> to vector<2x64xf32>
    %18 = arith.addf %16, %17 : vector<2x64xf32>
    %cst_14 = arith.constant 0.000000e+00 : f32
    %19 = vector.broadcast %cst_14 : f32 to vector<2x64xf32>
    %20 = arith.maximumf %18, %19 : vector<2x64xf32>
    %c0_15 = arith.constant 0 : index
    %c0_16 = arith.constant 0 : index
    %21 = vector.load %arg1[%c0_15, %c0_16] : memref<2x8xf32, #tpu.memory_space<vmem>>, vector<2x8xf32>
    %cst_17 = arith.constant dense<0.000000e+00> : vector<2x64xf32>
    %22 = tpu.matmul %21, %6, %cst_17 {dimension_numbers = #tpu.dot_dimension_numbers<[1], [0], [0], [1], [0, 0, 1, 1], [], []>} : vector<2x8xf32>, vector<8x64xf32>, vector<2x64xf32> -> vector<2x64xf32>
    %23 = vector.broadcast %7 : vector<1x64xf32> to vector<2x64xf32>
    %24 = arith.addf %22, %23 : vector<2x64xf32>
    %cst_18 = arith.constant 0.000000e+00 : f32
    %25 = vector.broadcast %cst_18 : f32 to vector<2x64xf32>
    %26 = arith.maximumf %24, %25 : vector<2x64xf32>
    %cst_19 = arith.constant dense<0.000000e+00> : vector<2x128xf32>
    %27 = tpu.matmul %20, %8, %cst_19 {dimension_numbers = #tpu.dot_dimension_numbers<[1], [0], [0], [1], [0, 0, 1, 1], [], []>} : vector<2x64xf32>, vector<64x128xf32>, vector<2x128xf32> -> vector<2x128xf32>
    %cst_20 = arith.constant dense<0.000000e+00> : vector<2x128xf32>
    %28 = tpu.matmul %26, %9, %cst_20 {dimension_numbers = #tpu.dot_dimension_numbers<[1], [0], [0], [1], [0, 0, 1, 1], [], []>} : vector<2x64xf32>, vector<64x128xf32>, vector<2x128xf32> -> vector<2x128xf32>
    %29 = arith.addf %27, %28 : vector<2x128xf32>
    %30 = vector.broadcast %13 : vector<1x128xf32> to vector<2x128xf32>
    %31 = arith.addf %29, %30 : vector<2x128xf32>
    %c0_i32_21 = arith.constant 0 : i32
    %32 = tpu.memref_slice %arg14[%c0_i32_21] : memref<2x!tpu.dma_semaphore, #tpu.memory_space<semaphore_mem>> -> memref<1x!tpu.dma_semaphore, #tpu.memory_space<semaphore_mem>>
    %33 = tpu.memref_squeeze %32 : memref<1x!tpu.dma_semaphore, #tpu.memory_space<semaphore_mem>> -> memref<!tpu.dma_semaphore, #tpu.memory_space<semaphore_mem>>
    tpu.wait_dma2 semaphore(%33 : memref<!tpu.dma_semaphore, #tpu.memory_space<semaphore_mem>>) src(%arg6 : memref<512x128xbf16, #tpu.memory_space<any>>) dst(%arg11 : memref<512x128xbf16, #tpu.memory_space<vmem>>)
    %c0_22 = arith.constant 0 : index
    %c0_23 = arith.constant 0 : index
    %34 = vector.load %arg2[%c0_22, %c0_23] : memref<8x512xbf16, #tpu.memory_space<vmem>>, vector<8x512xbf16>
    %c0_24 = arith.constant 0 : index
    %c0_25 = arith.constant 0 : index
    %35 = vector.load %arg11[%c0_24, %c0_25] : memref<512x128xbf16, #tpu.memory_space<vmem>>, vector<512x128xbf16>
    %cst_26 = arith.constant dense<0.000000e+00> : vector<8x128xf32>
    %36 = tpu.matmul %34, %35, %cst_26 {dimension_numbers = #tpu.dot_dimension_numbers<[1], [0], [0], [1], [0, 0, 1, 1], [], []>} : vector<8x512xbf16>, vector<512x128xbf16>, vector<8x128xf32> -> vector<8x128xf32>
    %37 = vector.shape_cast %36 : vector<8x128xf32> to vector<4x2x128xf32>
    %38 = vector.shape_cast %31 : vector<2x128xf32> to vector<1x2x128xf32>
    %39 = vector.broadcast %38 : vector<1x2x128xf32> to vector<4x2x128xf32>
    %40 = arith.addf %37, %39 : vector<4x2x128xf32>
    %cst_27 = arith.constant 0.000000e+00 : f32
    %41 = vector.broadcast %cst_27 : f32 to vector<2x32xf32>
    %cst_28 = arith.constant 0.000000e+00 : f32
    %42 = vector.broadcast %cst_28 : f32 to vector<2x32xf32>
    %cst_29 = arith.constant 0.000000e+00 : f32
    %43 = vector.broadcast %cst_29 : f32 to vector<2x32xf32>
    %cst_30 = arith.constant 0.000000e+00 : f32
    %44 = vector.broadcast %cst_30 : f32 to vector<2x32xf32>
    %45 = vector.extract_strided_slice %40 {offsets = [0, 0, 0], sizes = [1, 2, 128], strides = [1, 1, 1]} : vector<4x2x128xf32> to vector<1x2x128xf32>
    %46 = vector.shape_cast %45 : vector<1x2x128xf32> to vector<2x128xf32>
    %cst_31 = arith.constant dense<0.000000e+00> : vector<2x128xf32>
    %47 = tpu.matmul %41, %10, %cst_31 {dimension_numbers = #tpu.dot_dimension_numbers<[1], [0], [0], [1], [0, 0, 1, 1], [], []>} : vector<2x32xf32>, vector<32x128xf32>, vector<2x128xf32> -> vector<2x128xf32>
    %48 = arith.addf %46, %47 : vector<2x128xf32>
    %49 = math.tanh %48 : vector<2x128xf32>
    %cst_32 = arith.constant 5.000000e-01 : f32
    %50 = vector.broadcast %cst_32 : f32 to vector<2x128xf32>
    %51 = arith.mulf %50, %49 : vector<2x128xf32>
    %cst_33 = arith.constant 5.000000e-01 : f32
    %52 = vector.broadcast %cst_33 : f32 to vector<2x128xf32>
    %53 = arith.addf %51, %52 : vector<2x128xf32>
    %54 = vector.extract_strided_slice %53 {offsets = [0, 0], sizes = [2, 32], strides = [1, 1]} : vector<2x128xf32> to vector<2x32xf32>
    %55 = vector.extract_strided_slice %53 {offsets = [0, 32], sizes = [2, 32], strides = [1, 1]} : vector<2x128xf32> to vector<2x32xf32>
    %56 = vector.extract_strided_slice %49 {offsets = [0, 64], sizes = [2, 32], strides = [1, 1]} : vector<2x128xf32> to vector<2x32xf32>
    %57 = vector.extract_strided_slice %53 {offsets = [0, 96], sizes = [2, 32], strides = [1, 1]} : vector<2x128xf32> to vector<2x32xf32>
    %58 = arith.mulf %55, %42 : vector<2x32xf32>
    %59 = arith.mulf %54, %56 : vector<2x32xf32>
    %60 = arith.addf %58, %59 : vector<2x32xf32>
    %61 = math.tanh %60 : vector<2x32xf32>
    %62 = arith.mulf %57, %61 : vector<2x32xf32>
    %cst_34 = arith.constant dense<0.000000e+00> : vector<2x128xf32>
    %63 = tpu.matmul %62, %11, %cst_34 {dimension_numbers = #tpu.dot_dimension_numbers<[1], [0], [0], [1], [0, 0, 1, 1], [], []>} : vector<2x32xf32>, vector<32x128xf32>, vector<2x128xf32> -> vector<2x128xf32>
    %cst_35 = arith.constant dense<0.000000e+00> : vector<2x128xf32>
    %64 = tpu.matmul %43, %12, %cst_35 {dimension_numbers = #tpu.dot_dimension_numbers<[1], [0], [0], [1], [0, 0, 1, 1], [], []>} : vector<2x32xf32>, vector<32x128xf32>, vector<2x128xf32> -> vector<2x128xf32>
    %65 = arith.addf %63, %64 : vector<2x128xf32>
    %66 = vector.broadcast %14 : vector<1x128xf32> to vector<2x128xf32>
    %67 = arith.addf %65, %66 : vector<2x128xf32>
    %68 = math.tanh %67 : vector<2x128xf32>
    %cst_36 = arith.constant 5.000000e-01 : f32
    %69 = vector.broadcast %cst_36 : f32 to vector<2x128xf32>
    %70 = arith.mulf %69, %68 : vector<2x128xf32>
    %cst_37 = arith.constant 5.000000e-01 : f32
    %71 = vector.broadcast %cst_37 : f32 to vector<2x128xf32>
    %72 = arith.addf %70, %71 : vector<2x128xf32>
    %73 = vector.extract_strided_slice %72 {offsets = [0, 0], sizes = [2, 32], strides = [1, 1]} : vector<2x128xf32> to vector<2x32xf32>
    %74 = vector.extract_strided_slice %72 {offsets = [0, 32], sizes = [2, 32], strides = [1, 1]} : vector<2x128xf32> to vector<2x32xf32>
    %75 = vector.extract_strided_slice %68 {offsets = [0, 64], sizes = [2, 32], strides = [1, 1]} : vector<2x128xf32> to vector<2x32xf32>
    %76 = vector.extract_strided_slice %72 {offsets = [0, 96], sizes = [2, 32], strides = [1, 1]} : vector<2x128xf32> to vector<2x32xf32>
    %77 = arith.mulf %74, %44 : vector<2x32xf32>
    %78 = arith.mulf %73, %75 : vector<2x32xf32>
    %79 = arith.addf %77, %78 : vector<2x32xf32>
    %80 = math.tanh %79 : vector<2x32xf32>
    %81 = arith.mulf %76, %80 : vector<2x32xf32>
    %c0_38 = arith.constant 0 : index
    %c0_39 = arith.constant 0 : index
    %82 = vector.load %arg13[%c0_38, %c0_39] : memref<8x32xf32, #tpu.memory_space<vmem>>, vector<2x32xf32>
    tpu.vector_store %arg13[%c0_38, %c0_39], %81 {strides = array<i32>} : memref<8x32xf32, #tpu.memory_space<vmem>>, vector<2x32xf32>,
    %83 = vector.extract_strided_slice %40 {offsets = [1, 0, 0], sizes = [1, 2, 128], strides = [1, 1, 1]} : vector<4x2x128xf32> to vector<1x2x128xf32>
    %84 = vector.shape_cast %83 : vector<1x2x128xf32> to vector<2x128xf32>
    %cst_40 = arith.constant dense<0.000000e+00> : vector<2x128xf32>
    %85 = tpu.matmul %62, %10, %cst_40 {dimension_numbers = #tpu.dot_dimension_numbers<[1], [0], [0], [1], [0, 0, 1, 1], [], []>} : vector<2x32xf32>, vector<32x128xf32>, vector<2x128xf32> -> vector<2x128xf32>
    %86 = arith.addf %84, %85 : vector<2x128xf32>
    %87 = math.tanh %86 : vector<2x128xf32>
    %cst_41 = arith.constant 5.000000e-01 : f32
    %88 = vector.broadcast %cst_41 : f32 to vector<2x128xf32>
    %89 = arith.mulf %88, %87 : vector<2x128xf32>
    %cst_42 = arith.constant 5.000000e-01 : f32
    %90 = vector.broadcast %cst_42 : f32 to vector<2x128xf32>
    %91 = arith.addf %89, %90 : vector<2x128xf32>
    %92 = vector.extract_strided_slice %91 {offsets = [0, 0], sizes = [2, 32], strides = [1, 1]} : vector<2x128xf32> to vector<2x32xf32>
    %93 = vector.extract_strided_slice %91 {offsets = [0, 32], sizes = [2, 32], strides = [1, 1]} : vector<2x128xf32> to vector<2x32xf32>
    %94 = vector.extract_strided_slice %87 {offsets = [0, 64], sizes = [2, 32], strides = [1, 1]} : vector<2x128xf32> to vector<2x32xf32>
    %95 = vector.extract_strided_slice %91 {offsets = [0, 96], sizes = [2, 32], strides = [1, 1]} : vector<2x128xf32> to vector<2x32xf32>
    %96 = arith.mulf %93, %60 : vector<2x32xf32>
    %97 = arith.mulf %92, %94 : vector<2x32xf32>
    %98 = arith.addf %96, %97 : vector<2x32xf32>
    %99 = math.tanh %98 : vector<2x32xf32>
    %100 = arith.mulf %95, %99 : vector<2x32xf32>
    %cst_43 = arith.constant dense<0.000000e+00> : vector<2x128xf32>
    %101 = tpu.matmul %100, %11, %cst_43 {dimension_numbers = #tpu.dot_dimension_numbers<[1], [0], [0], [1], [0, 0, 1, 1], [], []>} : vector<2x32xf32>, vector<32x128xf32>, vector<2x128xf32> -> vector<2x128xf32>
    %cst_44 = arith.constant dense<0.000000e+00> : vector<2x128xf32>
    %102 = tpu.matmul %81, %12, %cst_44 {dimension_numbers = #tpu.dot_dimension_numbers<[1], [0], [0], [1], [0, 0, 1, 1], [], []>} : vector<2x32xf32>, vector<32x128xf32>, vector<2x128xf32> -> vector<2x128xf32>
    %103 = arith.addf %101, %102 : vector<2x128xf32>
    %104 = vector.broadcast %14 : vector<1x128xf32> to vector<2x128xf32>
    %105 = arith.addf %103, %104 : vector<2x128xf32>
    %106 = math.tanh %105 : vector<2x128xf32>
    %cst_45 = arith.constant 5.000000e-01 : f32
    %107 = vector.broadcast %cst_45 : f32 to vector<2x128xf32>
    %108 = arith.mulf %107, %106 : vector<2x128xf32>
    %cst_46 = arith.constant 5.000000e-01 : f32
    %109 = vector.broadcast %cst_46 : f32 to vector<2x128xf32>
    %110 = arith.addf %108, %109 : vector<2x128xf32>
    %111 = vector.extract_strided_slice %110 {offsets = [0, 0], sizes = [2, 32], strides = [1, 1]} : vector<2x128xf32> to vector<2x32xf32>
    %112 = vector.extract_strided_slice %110 {offsets = [0, 32], sizes = [2, 32], strides = [1, 1]} : vector<2x128xf32> to vector<2x32xf32>
    %113 = vector.extract_strided_slice %106 {offsets = [0, 64], sizes = [2, 32], strides = [1, 1]} : vector<2x128xf32> to vector<2x32xf32>
    %114 = vector.extract_strided_slice %110 {offsets = [0, 96], sizes = [2, 32], strides = [1, 1]} : vector<2x128xf32> to vector<2x32xf32>
    %115 = arith.mulf %112, %79 : vector<2x32xf32>
    %116 = arith.mulf %111, %113 : vector<2x32xf32>
    %117 = arith.addf %115, %116 : vector<2x32xf32>
    %118 = math.tanh %117 : vector<2x32xf32>
    %119 = arith.mulf %114, %118 : vector<2x32xf32>
    %c2 = arith.constant 2 : index
    %c0_47 = arith.constant 0 : index
    %120 = vector.load %arg13[%c2, %c0_47] : memref<8x32xf32, #tpu.memory_space<vmem>>, vector<2x32xf32>
    tpu.vector_store %arg13[%c2, %c0_47], %119 {strides = array<i32>} : memref<8x32xf32, #tpu.memory_space<vmem>>, vector<2x32xf32>,
    %121 = vector.extract_strided_slice %40 {offsets = [2, 0, 0], sizes = [1, 2, 128], strides = [1, 1, 1]} : vector<4x2x128xf32> to vector<1x2x128xf32>
    %122 = vector.shape_cast %121 : vector<1x2x128xf32> to vector<2x128xf32>
    %cst_48 = arith.constant dense<0.000000e+00> : vector<2x128xf32>
    %123 = tpu.matmul %100, %10, %cst_48 {dimension_numbers = #tpu.dot_dimension_numbers<[1], [0], [0], [1], [0, 0, 1, 1], [], []>} : vector<2x32xf32>, vector<32x128xf32>, vector<2x128xf32> -> vector<2x128xf32>
    %124 = arith.addf %122, %123 : vector<2x128xf32>
    %125 = math.tanh %124 : vector<2x128xf32>
    %cst_49 = arith.constant 5.000000e-01 : f32
    %126 = vector.broadcast %cst_49 : f32 to vector<2x128xf32>
    %127 = arith.mulf %126, %125 : vector<2x128xf32>
    %cst_50 = arith.constant 5.000000e-01 : f32
    %128 = vector.broadcast %cst_50 : f32 to vector<2x128xf32>
    %129 = arith.addf %127, %128 : vector<2x128xf32>
    %130 = vector.extract_strided_slice %129 {offsets = [0, 0], sizes = [2, 32], strides = [1, 1]} : vector<2x128xf32> to vector<2x32xf32>
    %131 = vector.extract_strided_slice %129 {offsets = [0, 32], sizes = [2, 32], strides = [1, 1]} : vector<2x128xf32> to vector<2x32xf32>
    %132 = vector.extract_strided_slice %125 {offsets = [0, 64], sizes = [2, 32], strides = [1, 1]} : vector<2x128xf32> to vector<2x32xf32>
    %133 = vector.extract_strided_slice %129 {offsets = [0, 96], sizes = [2, 32], strides = [1, 1]} : vector<2x128xf32> to vector<2x32xf32>
    %134 = arith.mulf %131, %98 : vector<2x32xf32>
    %135 = arith.mulf %130, %132 : vector<2x32xf32>
    %136 = arith.addf %134, %135 : vector<2x32xf32>
    %137 = math.tanh %136 : vector<2x32xf32>
    %138 = arith.mulf %133, %137 : vector<2x32xf32>
    %cst_51 = arith.constant dense<0.000000e+00> : vector<2x128xf32>
    %139 = tpu.matmul %138, %11, %cst_51 {dimension_numbers = #tpu.dot_dimension_numbers<[1], [0], [0], [1], [0, 0, 1, 1], [], []>} : vector<2x32xf32>, vector<32x128xf32>, vector<2x128xf32> -> vector<2x128xf32>
    %cst_52 = arith.constant dense<0.000000e+00> : vector<2x128xf32>
    %140 = tpu.matmul %119, %12, %cst_52 {dimension_numbers = #tpu.dot_dimension_numbers<[1], [0], [0], [1], [0, 0, 1, 1], [], []>} : vector<2x32xf32>, vector<32x128xf32>, vector<2x128xf32> -> vector<2x128xf32>
    %141 = arith.addf %139, %140 : vector<2x128xf32>
    %142 = vector.broadcast %14 : vector<1x128xf32> to vector<2x128xf32>
    %143 = arith.addf %141, %142 : vector<2x128xf32>
    %144 = math.tanh %143 : vector<2x128xf32>
    %cst_53 = arith.constant 5.000000e-01 : f32
    %145 = vector.broadcast %cst_53 : f32 to vector<2x128xf32>
    %146 = arith.mulf %145, %144 : vector<2x128xf32>
    %cst_54 = arith.constant 5.000000e-01 : f32
    %147 = vector.broadcast %cst_54 : f32 to vector<2x128xf32>
    %148 = arith.addf %146, %147 : vector<2x128xf32>
    %149 = vector.extract_strided_slice %148 {offsets = [0, 0], sizes = [2, 32], strides = [1, 1]} : vector<2x128xf32> to vector<2x32xf32>
    %150 = vector.extract_strided_slice %148 {offsets = [0, 32], sizes = [2, 32], strides = [1, 1]} : vector<2x128xf32> to vector<2x32xf32>
    %151 = vector.extract_strided_slice %144 {offsets = [0, 64], sizes = [2, 32], strides = [1, 1]} : vector<2x128xf32> to vector<2x32xf32>
    %152 = vector.extract_strided_slice %148 {offsets = [0, 96], sizes = [2, 32], strides = [1, 1]} : vector<2x128xf32> to vector<2x32xf32>
    %153 = arith.mulf %150, %117 : vector<2x32xf32>
    %154 = arith.mulf %149, %151 : vector<2x32xf32>
    %155 = arith.addf %153, %154 : vector<2x32xf32>
    %156 = math.tanh %155 : vector<2x32xf32>
    %157 = arith.mulf %152, %156 : vector<2x32xf32>
    %c4 = arith.constant 4 : index
    %c0_55 = arith.constant 0 : index
    %158 = vector.load %arg13[%c4, %c0_55] : memref<8x32xf32, #tpu.memory_space<vmem>>, vector<2x32xf32>
    tpu.vector_store %arg13[%c4, %c0_55], %157 {strides = array<i32>} : memref<8x32xf32, #tpu.memory_space<vmem>>, vector<2x32xf32>,
    %159 = vector.extract_strided_slice %40 {offsets = [3, 0, 0], sizes = [1, 2, 128], strides = [1, 1, 1]} : vector<4x2x128xf32> to vector<1x2x128xf32>
    %160 = vector.shape_cast %159 : vector<1x2x128xf32> to vector<2x128xf32>
    %cst_56 = arith.constant dense<0.000000e+00> : vector<2x128xf32>
    %161 = tpu.matmul %138, %10, %cst_56 {dimension_numbers = #tpu.dot_dimension_numbers<[1], [0], [0], [1], [0, 0, 1, 1], [], []>} : vector<2x32xf32>, vector<32x128xf32>, vector<2x128xf32> -> vector<2x128xf32>
    %162 = arith.addf %160, %161 : vector<2x128xf32>
    %163 = math.tanh %162 : vector<2x128xf32>
    %cst_57 = arith.constant 5.000000e-01 : f32
    %164 = vector.broadcast %cst_57 : f32 to vector<2x128xf32>
    %165 = arith.mulf %164, %163 : vector<2x128xf32>
    %cst_58 = arith.constant 5.000000e-01 : f32
    %166 = vector.broadcast %cst_58 : f32 to vector<2x128xf32>
    %167 = arith.addf %165, %166 : vector<2x128xf32>
    %168 = vector.extract_strided_slice %167 {offsets = [0, 0], sizes = [2, 32], strides = [1, 1]} : vector<2x128xf32> to vector<2x32xf32>
    %169 = vector.extract_strided_slice %167 {offsets = [0, 32], sizes = [2, 32], strides = [1, 1]} : vector<2x128xf32> to vector<2x32xf32>
    %170 = vector.extract_strided_slice %163 {offsets = [0, 64], sizes = [2, 32], strides = [1, 1]} : vector<2x128xf32> to vector<2x32xf32>
    %171 = vector.extract_strided_slice %167 {offsets = [0, 96], sizes = [2, 32], strides = [1, 1]} : vector<2x128xf32> to vector<2x32xf32>
    %172 = arith.mulf %169, %136 : vector<2x32xf32>
    %173 = arith.mulf %168, %170 : vector<2x32xf32>
    %174 = arith.addf %172, %173 : vector<2x32xf32>
    %175 = math.tanh %174 : vector<2x32xf32>
    %176 = arith.mulf %171, %175 : vector<2x32xf32>
    %cst_59 = arith.constant dense<0.000000e+00> : vector<2x128xf32>
    %177 = tpu.matmul %176, %11, %cst_59 {dimension_numbers = #tpu.dot_dimension_numbers<[1], [0], [0], [1], [0, 0, 1, 1], [], []>} : vector<2x32xf32>, vector<32x128xf32>, vector<2x128xf32> -> vector<2x128xf32>
    %cst_60 = arith.constant dense<0.000000e+00> : vector<2x128xf32>
    %178 = tpu.matmul %157, %12, %cst_60 {dimension_numbers = #tpu.dot_dimension_numbers<[1], [0], [0], [1], [0, 0, 1, 1], [], []>} : vector<2x32xf32>, vector<32x128xf32>, vector<2x128xf32> -> vector<2x128xf32>
    %179 = arith.addf %177, %178 : vector<2x128xf32>
    %180 = vector.broadcast %14 : vector<1x128xf32> to vector<2x128xf32>
    %181 = arith.addf %179, %180 : vector<2x128xf32>
    %182 = math.tanh %181 : vector<2x128xf32>
    %cst_61 = arith.constant 5.000000e-01 : f32
    %183 = vector.broadcast %cst_61 : f32 to vector<2x128xf32>
    %184 = arith.mulf %183, %182 : vector<2x128xf32>
    %cst_62 = arith.constant 5.000000e-01 : f32
    %185 = vector.broadcast %cst_62 : f32 to vector<2x128xf32>
    %186 = arith.addf %184, %185 : vector<2x128xf32>
    %187 = vector.extract_strided_slice %186 {offsets = [0, 0], sizes = [2, 32], strides = [1, 1]} : vector<2x128xf32> to vector<2x32xf32>
    %188 = vector.extract_strided_slice %186 {offsets = [0, 32], sizes = [2, 32], strides = [1, 1]} : vector<2x128xf32> to vector<2x32xf32>
    %189 = vector.extract_strided_slice %182 {offsets = [0, 64], sizes = [2, 32], strides = [1, 1]} : vector<2x128xf32> to vector<2x32xf32>
    %190 = vector.extract_strided_slice %186 {offsets = [0, 96], sizes = [2, 32], strides = [1, 1]} : vector<2x128xf32> to vector<2x32xf32>
    %191 = arith.mulf %188, %155 : vector<2x32xf32>
    %192 = arith.mulf %187, %189 : vector<2x32xf32>
    %193 = arith.addf %191, %192 : vector<2x32xf32>
    %194 = math.tanh %193 : vector<2x32xf32>
    %195 = arith.mulf %190, %194 : vector<2x32xf32>
    %c6 = arith.constant 6 : index
    %c0_63 = arith.constant 0 : index
    %196 = vector.load %arg13[%c6, %c0_63] : memref<8x32xf32, #tpu.memory_space<vmem>>, vector<2x32xf32>
    tpu.vector_store %arg13[%c6, %c0_63], %195 {strides = array<i32>} : memref<8x32xf32, #tpu.memory_space<vmem>>, vector<2x32xf32>,
    %c0_64 = arith.constant 0 : index
    %c0_65 = arith.constant 0 : index
    %c0_66 = arith.constant 0 : index
    %197 = vector.load %arg9[%c0_64, %c0_65, %c0_66] : memref<2x2x32xf32, #tpu.memory_space<vmem>>, vector<1x2x32xf32>
    %198 = vector.shape_cast %197 : vector<1x2x32xf32> to vector<2x32xf32>
    %199 = vector.shape_cast %176 : vector<2x32xf32> to vector<1x2x32xf32>
    tpu.vector_store %arg9[%c0_64, %c0_65, %c0_66], %199 {strides = array<i32>} : memref<2x2x32xf32, #tpu.memory_space<vmem>>, vector<1x2x32xf32>,
    %c1 = arith.constant 1 : index
    %c0_67 = arith.constant 0 : index
    %c0_68 = arith.constant 0 : index
    %200 = vector.load %arg9[%c1, %c0_67, %c0_68] : memref<2x2x32xf32, #tpu.memory_space<vmem>>, vector<1x2x32xf32>
    %201 = vector.shape_cast %200 : vector<1x2x32xf32> to vector<2x32xf32>
    %202 = vector.shape_cast %195 : vector<2x32xf32> to vector<1x2x32xf32>
    tpu.vector_store %arg9[%c1, %c0_67, %c0_68], %202 {strides = array<i32>} : memref<2x2x32xf32, #tpu.memory_space<vmem>>, vector<1x2x32xf32>,
    %c0_69 = arith.constant 0 : index
    %c0_70 = arith.constant 0 : index
    %c0_71 = arith.constant 0 : index
    %203 = vector.load %arg10[%c0_69, %c0_70, %c0_71] : memref<2x2x32xf32, #tpu.memory_space<vmem>>, vector<1x2x32xf32>
    %204 = vector.shape_cast %203 : vector<1x2x32xf32> to vector<2x32xf32>
    %205 = vector.shape_cast %174 : vector<2x32xf32> to vector<1x2x32xf32>
    tpu.vector_store %arg10[%c0_69, %c0_70, %c0_71], %205 {strides = array<i32>} : memref<2x2x32xf32, #tpu.memory_space<vmem>>, vector<1x2x32xf32>,
    %c1_72 = arith.constant 1 : index
    %c0_73 = arith.constant 0 : index
    %c0_74 = arith.constant 0 : index
    %206 = vector.load %arg10[%c1_72, %c0_73, %c0_74] : memref<2x2x32xf32, #tpu.memory_space<vmem>>, vector<1x2x32xf32>
    %207 = vector.shape_cast %206 : vector<1x2x32xf32> to vector<2x32xf32>
    %208 = vector.shape_cast %193 : vector<2x32xf32> to vector<1x2x32xf32>
    tpu.vector_store %arg10[%c1_72, %c0_73, %c0_74], %208 {strides = array<i32>} : memref<2x2x32xf32, #tpu.memory_space<vmem>>, vector<1x2x32xf32>,
    %c1_i32_75 = arith.constant 1 : i32
    %209 = tpu.memref_slice %arg14[%c1_i32_75] : memref<2x!tpu.dma_semaphore, #tpu.memory_space<semaphore_mem>> -> memref<1x!tpu.dma_semaphore, #tpu.memory_space<semaphore_mem>>
    %210 = tpu.memref_squeeze %209 : memref<1x!tpu.dma_semaphore, #tpu.memory_space<semaphore_mem>> -> memref<!tpu.dma_semaphore, #tpu.memory_space<semaphore_mem>>
    tpu.wait_dma2 semaphore(%210 : memref<!tpu.dma_semaphore, #tpu.memory_space<semaphore_mem>>) src(%arg7 : memref<32x512xbf16, #tpu.memory_space<any>>) dst(%arg12 : memref<32x512xbf16, #tpu.memory_space<vmem>>)
    %c0_76 = arith.constant 0 : index
    %c0_77 = arith.constant 0 : index
    %211 = vector.load %arg13[%c0_76, %c0_77] : memref<8x32xf32, #tpu.memory_space<vmem>>, vector<8x32xf32>
    %212 = arith.truncf %211 : vector<8x32xf32> to vector<8x32xbf16>
    %c0_78 = arith.constant 0 : index
    %c0_79 = arith.constant 0 : index
    %213 = vector.load %arg12[%c0_78, %c0_79] : memref<32x512xbf16, #tpu.memory_space<vmem>>, vector<32x512xbf16>
    %cst_80 = arith.constant dense<0.000000e+00> : vector<8x512xf32>
    %214 = tpu.matmul %212, %213, %cst_80 {dimension_numbers = #tpu.dot_dimension_numbers<[1], [0], [0], [1], [0, 0, 1, 1], [], []>} : vector<8x32xbf16>, vector<32x512xbf16>, vector<8x512xf32> -> vector<8x512xf32>
    %c0_81 = arith.constant 0 : index
    %c0_82 = arith.constant 0 : index
    %215 = vector.load %arg5[%c0_81, %c0_82] : memref<1x512xf32, #tpu.memory_space<vmem>>, vector<1x512xf32>
    %216 = vector.broadcast %215 : vector<1x512xf32> to vector<8x512xf32>
    %217 = arith.addf %214, %216 : vector<8x512xf32>
    %c0_83 = arith.constant 0 : index
    %c0_84 = arith.constant 0 : index
    %218 = vector.load %arg8[%c0_83, %c0_84] : memref<8x512xf32, #tpu.memory_space<vmem>>, vector<8x512xf32>
    tpu.vector_store %arg8[%c0_83, %c0_84], %217 {strides = array<i32>} : memref<8x512xf32, #tpu.memory_space<vmem>>, vector<8x512xf32>,
    return
  }
}

</mosaic_0001>

<bundles_post_ra>
// kernel: forward.1
= control target key start
LH: loop header
LB: loop body
LE: loop exit
PB: predicated region body
PF: predicated region fallthrough
CT: control target
= control target key end

     0   :  { %16 = vsyncpa [#allocation7], 0  ;;  %s3293_s0 = inlined_call_operand.vmem [shape: f32[2,8], index: 0, kind: input, shape index: {}]   ;;  %s3294_s1 = inlined_call_operand.vmem [shape: f32[2,8], index: 1, kind: input, shape index: {}]   ;;  %s3295_s2 = inlined_call_operand.vmem [shape: bf16[8,512], index: 2, kind: input, shape index: {}]   ;;  %s3296_s3 = inlined_call_operand.vmem [shape: f32[32,64], index: 3, kind: input, shape index: {}]   ;;  %s3297_s4 = inlined_call_operand.vmem [shape: f32[240,128], index: 4, kind: input, shape index: {}]   ;;  %s3298_s5 = inlined_call_operand.vmem [shape: f32[1,512], index: 5, kind: input, shape index: {}]   ;;  %s3299_s6 = inlined_call_operand.vmem [shape: bf16[512,128], index: 6, kind: input, shape index: {}]   ;;  %s3300_s7 = inlined_call_operand.vmem [shape: bf16[32,512], index: 7, kind: input, shape index: {}]   ;;  %s3301_s8 = inlined_call_operand.vmem [shape: f32[8,512], index: 8, kind: output, shape index: {0}]   ;;  %s3302_s9 = inlined_call_operand.hbm [shape: f32[2,2,32], index: 9, kind: output, shape index: {1}]   ;;  %s3303_s10 = inlined_call_operand.hbm [shape: f32[2,2,32], index: 10, kind: output, shape index: {2}]  }
   0x1   :  { %17 = vsyncpa [#allocation9], 0  ;;  %v2656_v0 = vld [vmem:[%s3299_s6] sm:$0xff]  ;;  %v2661_v1 = vld [vmem:[%s3299_s6 + $0x8] sm:$0xff] }
   0x2   :  { %v2666_v2 = vld [vmem:[%s3299_s6 + $0x10] sm:$0xff]  ;;  %v2671_v3 = vld [vmem:[%s3299_s6 + $0x18] sm:$0xff]  ;;  %v2676_v4 = vld [vmem:[%s3299_s6 + $0x20] sm:$0xff] }
   0x3   :  { %v2681_v5 = vld [vmem:[%s3299_s6 + $0x28] sm:$0xff]  ;;  %v2686_v6 = vld [vmem:[%s3299_s6 + $0x30] sm:$0xff]  ;;  %v2691_v7 = vld [vmem:[%s3299_s6 + $0x38] sm:$0xff] }
   0x4   :  { %v2696_v8 = vld [vmem:[%s3299_s6 + $0x40] sm:$0xff]  ;;  %v2701_v9 = vld [vmem:[%s3299_s6 + $0x48] sm:$0xff]  ;;  %v2706_v10 = vld [vmem:[%s3299_s6 + $0x50] sm:$0xff] }
   0x5   :  { %v2711_v11 = vld [vmem:[%s3299_s6 + $0x58] sm:$0xff]  ;;  %v2716_v12 = vld [vmem:[%s3299_s6 + $0x60] sm:$0xff]  ;;  %v2721_v13 = vld [vmem:[%s3299_s6 + $0x68] sm:$0xff] }
   0x6   :  { %v2726_v14 = vld [vmem:[%s3299_s6 + $0x70] sm:$0xff]  ;;  %v2731_v15 = vld [vmem:[%s3299_s6 + $0x78] sm:$0xff]  ;;  %v2736_v16 = vld [vmem:[%s3299_s6 + $0x80] sm:$0xff] }
   0x7   :  { %v2741_v17 = vld [vmem:[%s3299_s6 + $0x88] sm:$0xff]  ;;  %v2746_v18 = vld [vmem:[%s3299_s6 + $0x90] sm:$0xff]  ;;  %v2751_v19 = vld [vmem:[%s3299_s6 + $0x98] sm:$0xff] }
   0x8   :  { %v2756_v20 = vld [vmem:[%s3299_s6 + $0xa0] sm:$0xff]  ;;  %v2761_v21 = vld [vmem:[%s3299_s6 + $0xa8] sm:$0xff]  ;;  %v2766_v22 = vld [vmem:[%s3299_s6 + $0xb0] sm:$0xff] }
   0x9   :  { %v2771_v23 = vld [vmem:[%s3299_s6 + $0xb8] sm:$0xff]  ;;  %v2776_v24 = vld [vmem:[%s3299_s6 + $0xc0] sm:$0xff]  ;;  %v2781_v25 = vld [vmem:[%s3299_s6 + $0xc8] sm:$0xff] }
   0xa   :  { %v2786_v26 = vld [vmem:[%s3299_s6 + $0xd0] sm:$0xff]  ;;  %v2791_v27 = vld [vmem:[%s3299_s6 + $0xd8] sm:$0xff]  ;;  %v2796_v28 = vld [vmem:[%s3299_s6 + $0xe0] sm:$0xff] }
   0xb   :  { %v2801_v29 = vld [vmem:[%s3299_s6 + $0xe8] sm:$0xff]  ;;  %v2806_v30 = vld [vmem:[%s3299_s6 + $0xf0] sm:$0xff]  ;;  %v2811_v31 = vld [vmem:[%s3299_s6 + $0xf8] sm:$0xff] }
   0xc   :  { %134 = vsyncadd [#allocation5], 4096  ;;  %v153_v32 = vld [vmem:[%s3300_s7] sm:$0xf]  ;;  %v155_v33 = vld [vmem:[%s3300_s7 + $0x10] sm:$0xf] }
   0xd   :  { %154 = vst [vmem:[#allocation3] sm:$0xf] %v153_v32  ;;  %156 = vst [vmem:[#allocation3 + $0x4] sm:$0xf] %v155_v33  ;;  %v157_v34 = vld [vmem:[%s3300_s7 + $0x4] sm:$0xf] }
   0xe   :  { %v159_v35 = vld [vmem:[%s3300_s7 + $0x14] sm:$0xf]  ;;  %v161_v36 = vld [vmem:[%s3300_s7 + $0x8] sm:$0xf]  ;;  %158 = vst [vmem:[#allocation3 + $0x8] sm:$0xf] %v157_v34 }
   0xf   :  { %160 = vst [vmem:[#allocation3 + $0xc] sm:$0xf] %v159_v35  ;;  %162 = vst [vmem:[#allocation3 + $0x10] sm:$0xf] %v161_v36  ;;  %v163_v37 = vld [vmem:[%s3300_s7 + $0x18] sm:$0xf] }
  0x10   :  { %v165_v38 = vld [vmem:[%s3300_s7 + $0xc] sm:$0xf]  ;;  %v167_v39 = vld [vmem:[%s3300_s7 + $0x1c] sm:$0xff]   ;;  %164 = vst [vmem:[#allocation3 + $0x14] sm:$0xf] %v163_v37 }
  0x11   :  { %166 = vst [vmem:[#allocation3 + $0x18] sm:$0xf] %v165_v38  ;;  %168 = vst [vmem:[#allocation3 + $0x1c] sm:$0xff] %v167_v39   ;;  %v171_v40 = vld [vmem:[%s3300_s7 + $0x30] sm:$0xf] }
  0x12   :  { %v173_v41 = vld [vmem:[%s3300_s7 + $0x24] sm:$0xf]  ;;  %v175_v42 = vld [vmem:[%s3300_s7 + $0x34] sm:$0xf]  ;;  %172 = vst [vmem:[#allocation3 + $0x24] sm:$0xf] %v171_v40 }
  0x13   :  { %174 = vst [vmem:[#allocation3 + $0x28] sm:$0xf] %v173_v41  ;;  %176 = vst [vmem:[#allocation3 + $0x2c] sm:$0xf] %v175_v42  ;;  %v177_v43 = vld [vmem:[%s3300_s7 + $0x28] sm:$0xf] }
  0x14   :  { %v179_v44 = vld [vmem:[%s3300_s7 + $0x38] sm:$0xf]  ;;  %v181_v45 = vld [vmem:[%s3300_s7 + $0x2c] sm:$0xf]  ;;  %178 = vst [vmem:[#allocation3 + $0x30] sm:$0xf] %v177_v43 }
  0x15   :  { %180 = vst [vmem:[#allocation3 + $0x34] sm:$0xf] %v179_v44  ;;  %182 = vst [vmem:[#allocation3 + $0x38] sm:$0xf] %v181_v45  ;;  %v183_v46 = vld [vmem:[%s3300_s7 + $0x3c] sm:$0xf] }
  0x16   :  { %184 = vst [vmem:[#allocation3 + $0x3c] sm:$0xf] %v183_v46 }
  0x17   :  { %247 = vsyncadd [#allocation5 + $0x1], 1024  ;;  %v2861_v47 = vld [vmem:[%s3297_s4 + $0x80] sm:$0xff]  ;;  %v2866_v48 = vld [vmem:[%s3297_s4 + $0x88] sm:$0xff]  ;;  %v2587_v52 = vmov 0.0   ;;  %vm2588_vm0 = vmmov 0  }
  0x18   :  { %v2871_v49 = vld [vmem:[%s3297_s4 + $0x90] sm:$0xff]  ;;  %v2876_v50 = vld [vmem:[%s3297_s4 + $0x98] sm:$0xff]  ;;  %v2881_v51 = vld [vmem:[%s3297_s4 + $0xa0] sm:$0xff]  ;;  %2212 = vmatprep.subr.mxu0 %v2587_v52  ;;  %2217 = vmatprep.subr.mxu1 %v2587_v52  ;;  %vm287_vm1 = vcmask 64512   ;;  %v2589_v36 = vmov 0.0|0.0   ;;  %vm441_vm2 = vcmask 523264  }
  0x19   :  { %v2888_v53 = vld [vmem:[%s3297_s4 + $0xa8] sm:$0xff]  ;;  %v2893_v54 = vld [vmem:[%s3297_s4 + $0xb0] sm:$0xff]  ;;  %v2898_v55 = vld [vmem:[%s3297_s4 + $0xb8] sm:$0xff]  ;;  %2214 = vmatprep.mubr.msk.f32.mxu0 %vm2588_vm0, %v2587_v52  ;;  %2219 = vmatprep.mubr.msk.f32.mxu1 %vm2588_vm0, %v2587_v52 }
  0x1a   :  { %v2907_v56 = vld [vmem:[%s3297_s4 + $0xc0] sm:$0xff]  ;;  %v2912_v57 = vld [vmem:[%s3297_s4 + $0xc8] sm:$0xff]  ;;  %v2917_v58 = vld [vmem:[%s3297_s4 + $0xd0] sm:$0xff] }
  0x1b   :  { %v2922_v59 = vld [vmem:[%s3297_s4 + $0xd8] sm:$0xff]  ;;  %v2927_v60 = vld [vmem:[%s3297_s4 + $0xe8] ss:$0 sm:$0xff]  ;;  %v248_v61 = vld [vmem:[%s3296_s3] sm:$0xff] }
  0x1c   :  { %2213 = vmatpush3.msra.mxu0 %v248_v61  ;;  %v250_v62 = vld [vmem:[%s3296_s3 + $0x10] sm:$0xff]  ;;  %v282_v63 = vld [vmem:[%s3293_s0] sm:$0x3]  ;;  %v261_v34 = vld [vmem:[%s3297_s4 + $0x48] sm:$0xff] }
  0x1d   :  { %v362_v32 = vld [vmem:[%s3294_s1] sm:$0x3]  ;;  %2218 = vmatpush3.msra.mxu1 %v250_v62  ;;  %2215 = vmatmul.mubr.msk.f32.vlgmr.msra.gmra.mrb[0].mxu0 %vm287_vm1, %v282_v63  ;;  %v253_v38 = vld [vmem:[%s3297_s4 + $0x8] sm:$0xff]  ;;  %v262_v39 = vld [vmem:[%s3297_s4 + $0x50] sm:$0xff] }
  0x1e   :  { %v260_v33 = vld [vmem:[%s3297_s4 + $0x40] sm:$0xff]  ;;  %2220 = vmatmul.mubr.msk.f32.vlgmr.msra.gmra.mrb[0].mxu1 %vm287_vm1, %v362_v32  ;;  %2392 = vmatprep.subr.bf16.mxu0 %v2589_v36  ;;  %v263_v40 = vld [vmem:[%s3297_s4 + $0x58] sm:$0xff]  ;;  %v254_v42 = vld [vmem:[%s3297_s4 + $0x10] sm:$0xff] }
  0x1f   :  { %v252_v35 = vld [vmem:[%s3297_s4] sm:$0xff]  ;;  %v2393_v37 = vpack.c.bf16 %v261_v34, %v260_v33  ;;  %2404 = vmatprep.subr.bf16.mxu1 %v2589_v36  ;;  %v255_v43 = vld [vmem:[%s3297_s4 + $0x18] sm:$0xff]  ;;  %2238 = vmatprep.mubr.msk.f32.mxu0 %vm2588_vm0, %v2587_v52  ;;  %v2396_v44 = vpack.c.bf16 %v263_v40, %v262_v39  ;;  %v265_v61 = vld [vmem:[%s3297_s4 + $0x68] sm:$0xff] }
  0x20   :  { %v2405_v41 = vpack.c.bf16 %v253_v38, %v252_v35  ;;  %2257 = vmatprep.mubr.msk.f32.mxu1 %vm2588_vm0, %v2587_v52  ;;  %v2408_v45 = vpack.c.bf16 %v255_v43, %v254_v42  ;;  %v264_v46 = vld [vmem:[%s3297_s4 + $0x60] sm:$0xff]  ;;  %v257_v63 = vld [vmem:[%s3297_s4 + $0x28] sm:$0xff]  ;;  %v266_v34 = vld [vmem:[%s3297_s4 + $0x70] sm:$0xff] }
  0x21   :  { %2394 = vmatpush3.bf16.msra.mxu0 %v2393_v37  ;;  %v256_v62 = vld [vmem:[%s3297_s4 + $0x20] sm:$0xff]  ;;  %v2399_v32 = vpack.c.bf16 %v265_v61, %v264_v46  ;;  %v267_v35 = vld [vmem:[%s3297_s4 + $0x78] sm:$0xff]  ;;  %v258_v37 = vld [vmem:[%s3297_s4 + $0x30] sm:$0xff] }
  0x22   :  { %2406 = vmatpush3.bf16.msra.mxu1 %v2405_v41  ;;  %2395 = vmatprep.subr.bf16.mxu0 %v2589_v36  ;;  %v2411_v33 = vpack.c.bf16 %v257_v63, %v256_v62  ;;  %v2402_v38 = vpack.c.bf16 %v267_v35, %v266_v34  ;;  %v259_v39 = vld [vmem:[%s3297_s4 + $0x38] sm:$0xff]  ;;  %v2060_v41 = vld [vmem:[%s3296_s3 + $0x8] ss:$0 sm:$0xff]  ;;  %v2066_v35 = vld [vmem:[%s3297_s4 + $0xe0] ss:$0 sm:$0xff] }
  0x23   :  { %2407 = vmatprep.subr.bf16.mxu1 %v2589_v36  ;;  %v2414_v40 = vpack.c.bf16 %v259_v39, %v258_v37  ;;  %v2062_v42 = vld [vmem:[%s3296_s3 + $0x18] ss:$0 sm:$0xff] }
  0x25   :  { %2397 = vmatpush3.bf16.msra.mxu0 %v2396_v44 }
  0x26   :  { %2409 = vmatpush3.bf16.msra.mxu1 %v2408_v45  ;;  %2398 = vmatprep.subr.bf16.mxu0 %v2589_v36 }
  0x27   :  { %2410 = vmatprep.subr.bf16.mxu1 %v2589_v36 }
  0x29   :  { %2400 = vmatpush3.bf16.msra.mxu0 %v2399_v32 }
  0x2a   :  { %2412 = vmatpush3.bf16.msra.mxu1 %v2411_v33  ;;  %2401 = vmatprep.subr.bf16.mxu0 %v2589_v36 }
  0x2b   :  { %2413 = vmatprep.subr.bf16.mxu1 %v2589_v36 }
  0x2d   :  { %2403 = vmatpush3.bf16.msra.mxu0 %v2402_v38 }
  0x2e   :  { %2415 = vmatpush3.bf16.msra.mxu1 %v2414_v40  ;;  %2108 = vmatprep.subr.bf16.mxu0 %v2696_v8 }
  0x2f   :  { %2130 = vmatprep.subr.bf16.mxu1 %v2776_v24 }
  0xf0   :  { %v357_v43 = vpop.f32.mrb[0].mxu0 }
  0xf1   :  { %v358_v44 = vadd.f32 %v2060_v41, %v357_v43  ;;  %v436_v45 = vpop.f32.mrb[0].mxu1  ;;  %v2216_v46 = vpop.f32.mrb[1].mxu0 }
  0xf2   :  { %v437_v61 = vadd.f32 %v2062_v42, %v436_v45  ;;  %v2221_v62 = vpop.f32.mrb[1].mxu1 }
  0xf3   :  { %v361_v63 = vmax.f32 %v358_v44, 0.0 }
  0xf4   :  { %v440_v32 = vmax.f32 %v437_v61, 0.0 }
  0xf5   :  { %2258 = vmatmul.mubr.msk.f32.vlgmr.msra.gmra.mrb[2].mxu1 %vm441_vm2, %v361_v63 }
  0xf6   :  { %2239 = vmatmul.mubr.msk.f32.vlgmr.msra.gmra.mrb[2].mxu0 %vm441_vm2, %v440_v32 }
 0x1c8   :  { %v584_v33 = vpop.f32.mrb[2].mxu1 }
 0x1c9   :  { %v511_v34 = vpop.f32.mrb[2].mxu0  ;;  %v2259_v37 = vpop.f32.mrb[3].mxu1 }
 0x1ca   :  { %v585_v38 = vadd.f32 %v584_v33, %v511_v34  ;;  %v2240_v39 = vpop.f32.mrb[3].mxu0 }
 0x1cc   :  { %v3010_v40 = vadd.f32 %v2066_v35, %v585_v38 }
 0x1cd   :  { %2579 = dma.done.wait [#allocation5], 4096 }
 0x1ce   :  { %2580 = vsyncadd [#allocation5], 4294963200  ;;  %2109 = vmatpush3.bf16.msra.mxu0 %v2656_v0  ;;  %2131 = vmatpush3.bf16.msra.mxu1 %v2736_v16  ;;  %v597_v8 = vld [vmem:[%s3295_s2] sm:$0xff]  ;;  %v598_v0 = vld [vmem:[%s3295_s2 + $0x8] sm:$0xff]  ;;  %s2591_s2 = smov 64   ;;  %s2592_s29 = smov 32   ;;  %v3088_v43 = vpack.c.bf16 %v2912_v57, %v2907_v56  ;;  %v3092_v44 = vpack.c.bf16 %v2888_v53, %v2881_v51  ;;  %v3097_v45 = vpack.c.bf16 %v2922_v59, %v2917_v58 }
 0x1cf   :  { %2110 = vmatprep.subr.bf16.mxu0 %v2701_v9  ;;  %2132 = vmatprep.subr.bf16.mxu1 %v2781_v25  ;;  %v2068_v16 = vcombine.high %v597_v8, %v597_v8  ;;  %v2070_v9 = vcombine.high %v598_v0, %v598_v0  ;;  %v3102_v46 = vpack.c.bf16 %v2898_v55, %v2893_v54  ;;  %vm751_vm3 = vcmask 261120   ;;  %s2593_s30 = smov 96  }
 0x1d0   :  { %vm1027_vm4 = vcmask 254976  }
 0x1d1   :  { %677 = vmatprep.mubr.bf16.mxu0 %v2068_v16  ;;  %717 = vmatprep.mubr.bf16.mxu1 %v2070_v9 }
 0x1d2   :  { %2111 = vmatpush3.bf16.msra.mxu0 %v2661_v1  ;;  %2133 = vmatpush3.bf16.msra.mxu1 %v2741_v17  ;;  %v2067_v1 = vcombine.low %v597_v8, %v597_v8 }
 0x1d3   :  { %2112 = vmatprep.subr.bf16.mxu0 %v2706_v10  ;;  %2134 = vmatprep.subr.bf16.mxu1 %v2786_v26 }
 0x1d6   :  { %2113 = vmatpush3.bf16.msra.mxu0 %v2666_v2  ;;  %2135 = vmatpush3.bf16.msra.mxu1 %v2746_v18  ;;  %v2069_v2 = vcombine.low %v598_v0, %v598_v0 }
 0x1d7   :  { %2114 = vmatprep.subr.bf16.mxu0 %v2711_v11  ;;  %2136 = vmatprep.subr.bf16.mxu1 %v2791_v27 }
 0x1da   :  { %2115 = vmatpush3.bf16.msra.mxu0 %v2671_v3  ;;  %2137 = vmatpush3.bf16.msra.mxu1 %v2751_v19  ;;  %v3052_v3 = vpack.c.bf16 %v2866_v48, %v2861_v47 }
 0x1db   :  { %2116 = vmatprep.subr.bf16.mxu0 %v2716_v12  ;;  %2138 = vmatprep.subr.bf16.mxu1 %v2796_v28 }
 0x1de   :  { %2117 = vmatpush3.bf16.msra.mxu0 %v2676_v4  ;;  %2139 = vmatpush3.bf16.msra.mxu1 %v2756_v20  ;;  %v3059_v4 = vpack.c.bf16 %v2876_v50, %v2871_v49 }
 0x1df   :  { %2118 = vmatprep.subr.bf16.mxu0 %v2721_v13  ;;  %2140 = vmatprep.subr.bf16.mxu1 %v2801_v29 }
 0x1e2   :  { %2119 = vmatpush3.bf16.msra.mxu0 %v2681_v5  ;;  %2141 = vmatpush3.bf16.msra.mxu1 %v2761_v21  ;;  %v2590_v5 = vmov 1983009808  }
 0x1e3   :  { %2120 = vmatprep.subr.bf16.mxu0 %v2726_v14  ;;  %2142 = vmatprep.subr.bf16.mxu1 %v2806_v30 }
 0x1e6   :  { %2121 = vmatpush3.bf16.msra.mxu0 %v2686_v6  ;;  %2143 = vmatpush3.bf16.msra.mxu1 %v2766_v22  ;;  %v728_v6 = vunpack.c.l.s4 %v2590_v5 }
 0x1e7   :  { %2122 = vmatprep.subr.bf16.mxu0 %v2731_v15  ;;  %2144 = vmatprep.subr.bf16.mxu1 %v2811_v31 }
 0x1e8   :  { %v729_v10 = vunpack.c.0.s8 %v728_v6 }
 0x1ea   :  { %2123 = vmatpush3.bf16.msra.mxu0 %v2691_v7  ;;  %2145 = vmatpush3.bf16.msra.mxu1 %v2771_v23  ;;  %v730_v7 = vlaneseq }
 0x1eb   :  { %2416 = vmatprep.subr.bf16.mxu0 %v2589_v36  ;;  %2422 = vmatprep.subr.bf16.mxu1 %v2589_v36 }
 0x1ec   :  { %v3071_v11 = vshrl.u32 %v730_v7, 7 }
 0x1ed   :  { %678 = vmatmul.mubr.bf16.vlgmr.msra.gmra.mrb[4].mxu0 %v2067_v1  ;;  %718 = vmatmul.mubr.bf16.vlgmr.msra.gmra.mrb[4].mxu1 %v2069_v2 }
 0x1ee   :  { %2418 = vmatpush3.bf16.msra.mxu0 %v3052_v3  ;;  %2268 = vmatprep.mubr.msk.f32.mxu0 %vm2588_vm0, %v2587_v52  ;;  %v3074_v21 = vsub.s32 %v729_v10, %v3071_v11 }
 0x1ef   :  { %2419 = vmatprep.subr.bf16.mxu0 %v2589_v36  ;;  %2279 = vmatprep.mubr.msk.f32.mxu1 %vm2588_vm0, %v2587_v52 }
 0x1f0   :  { %2424 = vmatpush3.bf16.msra.mxu1 %v3088_v43 }
 0x1f1   :  { %2425 = vmatprep.subr.bf16.mxu1 %v2589_v36 }
 0x1f2   :  { %2421 = vmatpush3.bf16.msra.mxu0 %v3059_v4 }
 0x1f3   :  { %2428 = vmatprep.subr.bf16.mxu0 %v2589_v36 }
 0x1f4   :  { %2427 = vmatpush3.bf16.msra.mxu1 %v3097_v45 }
 0x1f5   :  { %2269 = vmatmul.mubr.f32.vlgmr.msra.gmra.mrb[8].mxu0 %v2587_v52  ;;  %2434 = vmatprep.subr.bf16.mxu1 %v2589_v36 }
 0x1f6   :  { %2290 = vmatprep.mubr.msk.f32.mxu0 %vm2588_vm0, %v2587_v52  ;;  %2430 = vmatpush3.bf16.msra.mxu0 %v3092_v44 }
 0x1f7   :  { %2431 = vmatprep.subr.bf16.mxu0 %v2589_v36  ;;  %2280 = vmatmul.mubr.f32.vlgmr.msra.gmra.mrb[8].mxu1 %v2587_v52 }
 0x1f8   :  { %2436 = vmatpush3.bf16.msra.mxu1 %v3052_v3  ;;  %2301 = vmatprep.mubr.msk.f32.mxu1 %vm2588_vm0, %v2587_v52 }
 0x1f9   :  { %2437 = vmatprep.subr.bf16.mxu1 %v2589_v36 }
 0x1fa   :  { %2433 = vmatpush3.bf16.msra.mxu0 %v3102_v46 }
 0x1fb   :  { %2440 = vmatprep.subr.bf16.mxu0 %v2589_v36 }
 0x1fc   :  { %2439 = vmatpush3.bf16.msra.mxu1 %v3059_v4 }
 0x1fd   :  { %2446 = vmatprep.subr.bf16.mxu1 %v2589_v36 }
 0x2c0   :  { %v2124_v12 = vpop.f32.mrb[4].mxu0  ;;  %v2146_v13 = vpop.f32.mrb[4].mxu1 }
 0x2c1   :  { %v2125_v14 = vpop.f32.mrb[5].mxu0  ;;  %v2147_v15 = vpop.f32.mrb[5].mxu1 }
 0x2c2   :  { %v2126_v17 = vadd.f32 %v2125_v14, %v2124_v12  ;;  %v2148_v18 = vadd.f32 %v2147_v15, %v2146_v13  ;;  %v2127_v19 = vpop.f32.mrb[6].mxu0  ;;  %v2149_v20 = vpop.f32.mrb[6].mxu1 }
 0x2c3   :  { %v2128_v22 = vpop.f32.mrb[7].mxu0  ;;  %v2150_v23 = vpop.f32.mrb[7].mxu1 }
 0x2c4   :  { %v3076_v24 = vadd.f32 %v2148_v18, %v2126_v17 }
 0x2c6   :  { %v733_v25 = vrot.slane %v3076_v24, %v3074_v21 }
 0x2c8   :  { %v747_v26 = vadd.f32 %v733_v25, %v3010_v40  ;;  %v821_v27 = vpop.f32.mrb[8].mxu0  ;;  %v741_v59 = vcombine.high %v733_v25, %v733_v25 }
 0x2c9   :  { %v2270_v28 = vpop.f32.mrb[9].mxu0 }
 0x2ca   :  { %v825_v29 = vadd.f32 %v821_v27, %v747_v26  ;;  %v912_v56 = vpop.f32.mrb[8].mxu1  ;;  %v748_v61 = vadd.f32 %v741_v59, %v3010_v40  ;;  %v726_v28 = vcombine.high %v3076_v24, %v3076_v24 }
 0x2cb   :  { %v2281_v57 = vpop.f32.mrb[9].mxu1 }
 0x2cc   :  { %2503 = vtanh.f32 %v825_v29 }
 0x2d6   :  { %v2504_v30 = vpop.eup %2503 }
 0x2d7   :  { %831 = vrot.lane.b32.xlu0 %v2504_v30, %s2591_s2  ;;  %v827_v31 = vmul.f32 0.5, %v2504_v30 }
 0x2d9   :  { %v828_v47 = vadd.f32 0.5, %v827_v31 }
 0x2db   :  { %v829_v50 = vmul.f32 0.0, %v828_v47 }
 0x349   :  { %v832_v48 = vpop.permute.xlu0 %831 }
 0x34a   :  { %v834_v49 = vmul.f32 %v832_v48, %v828_v47 }
 0x34c   :  { %836 = vrot.lane.b32.xlu0 %v834_v49, %s2592_s29 }
 0x3be   :  { %v837_v41 = vpop.permute.xlu0 %836 }
 0x3bf   :  { %v3083_v42 = vadd.f32 %v837_v41, %v829_v50  ;;  %v3178_v50 = vrot.slane %v726_v28, %v3074_v21 }
 0x3c1   :  { %2505 = vtanh.f32 %v3083_v42  ;;  %v749_v41 = vadd.f32 %v3178_v50, %v3010_v40 }
 0x3cb   :  { %v2506_v51 = vpop.eup %2505 }
 0x3cc   :  { %842 = vrot.lane.b32.xlu1 %v2506_v51, %s2591_s2 }
 0x43e   :  { %v843_v53 = vpop.permute.xlu1 %842 }
 0x43f   :  { %v845_v54 = vmul.f32 %v843_v53, %v828_v47 }
 0x441   :  { %v923_v55 = vrot.slane %v845_v54, %v3074_v21 }
 0x443   :  { %924 = vrot.lane.b32.xlu1 %v923_v55, %s2592_s29 }
 0x4b5   :  { %v925_v58 = vpop.permute.xlu1 %924 }
 0x4b6   :  { %2291 = vmatmul.mubr.msk.f32.vlgmr.msra.gmra.mrb[10].mxu0 %vm751_vm3, %v925_v58  ;;  %2302 = vmatmul.mubr.msk.f32.vlgmr.msra.gmra.mrb[10].mxu1 %vm751_vm3, %v925_v58 }
 0x4b7   :  { %2442 = vmatpush3.bf16.msra.mxu0 %v3088_v43  ;;  %2448 = vmatpush3.bf16.msra.mxu1 %v3092_v44 }
 0x4b8   :  { %2443 = vmatprep.subr.bf16.mxu0 %v2589_v36  ;;  %2449 = vmatprep.subr.bf16.mxu1 %v2589_v36 }
 0x4b9   :  { %2312 = vmatprep.mubr.msk.f32.mxu0 %vm2588_vm0, %v2587_v52  ;;  %2323 = vmatprep.mubr.msk.f32.mxu1 %vm2588_vm0, %v2587_v52 }
 0x4bb   :  { %2445 = vmatpush3.bf16.msra.mxu0 %v3097_v45  ;;  %2451 = vmatpush3.bf16.msra.mxu1 %v3102_v46 }
 0x4bc   :  { %2452 = vmatprep.subr.bf16.mxu0 %v2589_v36  ;;  %2458 = vmatprep.subr.bf16.mxu1 %v2589_v36 }
 0x589   :  { %v994_v62 = vpop.f32.mrb[10].mxu0  ;;  %v1095_v63 = vpop.f32.mrb[10].mxu1 }
 0x58a   :  { %v995_v32 = vadd.f32 %v994_v62, %v912_v56  ;;  %v1099_v33 = vadd.f32 %v1095_v63, %v748_v61  ;;  %v2292_v34 = vpop.f32.mrb[11].mxu0  ;;  %v2303_v35 = vpop.f32.mrb[11].mxu1 }
 0x58c   :  { %v1002_v37 = vadd.f32 %v2927_v60, %v995_v32  ;;  %2507 = vtanh.f32 %v1099_v33 }
 0x58e   :  { %2509 = vtanh.f32 %v1002_v37 }
 0x596   :  { %v2508_v38 = vpop.eup %2507 }
 0x597   :  { %1105 = vrot.lane.b32.xlu0 %v2508_v38, %s2591_s2  ;;  %v1101_v8 = vmul.f32 0.5, %v2508_v38 }
 0x598   :  { %v2510_v39 = vpop.eup %2509 }
 0x599   :  { %1008 = vrot.lane.b32.xlu1 %v2510_v39, %s2591_s2  ;;  %v1004_v0 = vmul.f32 0.5, %v2510_v39  ;;  %v1102_v16 = vadd.f32 0.5, %v1101_v8 }
 0x59b   :  { %v1005_v2 = vadd.f32 0.5, %v1004_v0  ;;  %v1103_v7 = vmul.f32 %v1102_v16, %v3083_v42 }
 0x59d   :  { %v1006_v13 = vmul.f32 0.0, %v1005_v2 }
 0x609   :  { %v1106_v9 = vpop.permute.xlu0 %1105 }
 0x60a   :  { %v1108_v1 = vmul.f32 %v1106_v9, %v1102_v16 }
 0x60b   :  { %v1009_v5 = vpop.permute.xlu1 %1008 }
 0x60c   :  { %v1011_v6 = vmul.f32 %v1009_v5, %v1005_v2  ;;  %1110 = vrot.lane.b32.xlu0 %v1108_v1, %s2592_s29 }
 0x60e   :  { %1013 = vrot.lane.b32.xlu1 %v1011_v6, %s2592_s29 }
 0x67e   :  { %v1111_v10 = vpop.permute.xlu0 %1110 }
 0x67f   :  { %v3141_v12 = vadd.f32 %v1111_v10, %v1103_v7 }
 0x680   :  { %v1014_v14 = vpop.permute.xlu1 %1013 }
 0x681   :  { %2511 = vtanh.f32 %v3141_v12  ;;  %v3144_v15 = vadd.f32 %v1014_v14, %v1006_v13 }
 0x683   :  { %2513 = vtanh.f32 %v3144_v15 }
 0x68b   :  { %v2512_v17 = vpop.eup %2511 }
 0x68c   :  { %1116 = vrot.lane.b32.xlu0 %v2512_v17, %s2591_s2 }
 0x68d   :  { %v2514_v18 = vpop.eup %2513 }
 0x68e   :  { %1019 = vrot.lane.b32.xlu1 %v2514_v18, %s2591_s2 }
 0x6fe   :  { %v1117_v19 = vpop.permute.xlu0 %1116 }
 0x6ff   :  { %v1119_v20 = vmul.f32 %v1117_v19, %v1102_v16 }
 0x700   :  { %v1020_v22 = vpop.permute.xlu1 %1019 }
 0x701   :  { %v1199_v23 = vrot.slane %v1119_v20, %v3074_v21  ;;  %v1022_v25 = vmul.f32 %v1020_v22, %v1005_v2 }
 0x703   :  { %1024 = vrot.lane.b32.xlu0 %v1022_v25, %s2592_s29  ;;  %1200 = vrot.lane.b32.xlu1 %v1199_v23, %s2592_s29 }
 0x775   :  { %v1201_v26 = vpop.permute.xlu1 %1200  ;;  %v1025_v27 = vpop.permute.xlu0 %1024 }
 0x776   :  { %1028 = vst.msk [vmem:[#allocation4] sm:$0x3] %vm1027_vm4, %v1025_v27  ;;  %2313 = vmatmul.mubr.msk.f32.vlgmr.msra.gmra.mrb[12].mxu0 %vm751_vm3, %v1025_v27  ;;  %2324 = vmatmul.mubr.msk.f32.vlgmr.msra.gmra.mrb[12].mxu1 %vm751_vm3, %v1201_v26 }
 0x777   :  { %2454 = vmatpush3.bf16.msra.mxu0 %v3052_v3  ;;  %2334 = vmatprep.mubr.msk.f32.mxu0 %vm2588_vm0, %v2587_v52 }
 0x778   :  { %2455 = vmatprep.subr.bf16.mxu0 %v2589_v36  ;;  %2460 = vmatpush3.bf16.msra.mxu1 %v3088_v43 }
 0x779   :  { %2461 = vmatprep.subr.bf16.mxu1 %v2589_v36  ;;  %2345 = vmatprep.mubr.msk.f32.mxu1 %vm2588_vm0, %v2587_v52 }
 0x77b   :  { %2457 = vmatpush3.bf16.msra.mxu0 %v3059_v4 }
 0x77c   :  { %2463 = vmatpush3.bf16.msra.mxu1 %v3097_v45  ;;  %2464 = vmatprep.subr.bf16.mxu0 %v2589_v36 }
 0x77d   :  { %2470 = vmatprep.subr.bf16.mxu1 %v2589_v36 }
 0x77e   :  { %2335 = vmatmul.mubr.msk.f32.vlgmr.msra.gmra.mrb[14].mxu0 %vm751_vm3, %v1201_v26 }
 0x77f   :  { %2466 = vmatpush3.bf16.msra.mxu0 %v3092_v44  ;;  %2356 = vmatprep.mubr.msk.f32.mxu0 %vm2588_vm0, %v2587_v52 }
 0x780   :  { %2467 = vmatprep.subr.bf16.mxu0 %v2589_v36 }
 0x783   :  { %2469 = vmatpush3.bf16.msra.mxu0 %v3102_v46 }
 0x784   :  { %2476 = vmatprep.subr.bf16.mxu0 %v2589_v36 }
 0x849   :  { %v1188_v29 = vpop.f32.mrb[12].mxu0  ;;  %v1270_v30 = vpop.f32.mrb[12].mxu1 }
 0x84a   :  { %v1271_v31 = vadd.f32 %v1270_v30, %v1188_v29  ;;  %v2314_v47 = vpop.f32.mrb[13].mxu0  ;;  %v2325_v48 = vpop.f32.mrb[13].mxu1 }
 0x84c   :  { %v1274_v49 = vadd.f32 %v2927_v60, %v1271_v31 }
 0x84e   :  { %2515 = vtanh.f32 %v1274_v49 }
 0x851   :  { %v1366_v42 = vpop.f32.mrb[14].mxu0 }
 0x852   :  { %v1370_v51 = vadd.f32 %v1366_v42, %v749_v41  ;;  %v2336_v53 = vpop.f32.mrb[15].mxu0 }
 0x854   :  { %2517 = vtanh.f32 %v1370_v51 }
 0x858   :  { %v2516_v54 = vpop.eup %2515 }
 0x859   :  { %1280 = vrot.lane.b32.xlu0 %v2516_v54, %s2591_s2  ;;  %v1276_v55 = vmul.f32 0.5, %v2516_v54 }
 0x85b   :  { %v1277_v56 = vadd.f32 0.5, %v1276_v55 }
 0x85d   :  { %v1278_v32 = vmul.f32 %v1277_v56, %v3144_v15 }
 0x85e   :  { %v2518_v24 = vpop.eup %2517 }
 0x85f   :  { %1376 = vrot.lane.b32.xlu1 %v2518_v24, %s2591_s2  ;;  %v1372_v59 = vmul.f32 0.5, %v2518_v24 }
 0x861   :  { %v1373_v61 = vadd.f32 0.5, %v1372_v59 }
 0x863   :  { %v1374_v35 = vmul.f32 %v1373_v61, %v3141_v12 }
 0x8cb   :  { %v1281_v57 = vpop.permute.xlu0 %1280 }
 0x8cc   :  { %v1283_v58 = vmul.f32 %v1281_v57, %v1277_v56 }
 0x8ce   :  { %1285 = vrot.lane.b32.xlu0 %v1283_v58, %s2592_s29 }
 0x8d1   :  { %v1377_v62 = vpop.permute.xlu1 %1376 }
 0x8d2   :  { %v1379_v63 = vmul.f32 %v1377_v62, %v1373_v61 }
 0x8d4   :  { %1381 = vrot.lane.b32.xlu1 %v1379_v63, %s2592_s29 }
 0x940   :  { %v1286_v33 = vpop.permute.xlu0 %1285 }
 0x941   :  { %v3187_v34 = vadd.f32 %v1286_v33, %v1278_v32 }
 0x943   :  { %2519 = vtanh.f32 %v3187_v34 }
 0x946   :  { %v1382_v37 = vpop.permute.xlu1 %1381 }
 0x947   :  { %v1384_v38 = vadd.f32 %v1382_v37, %v1374_v35 }
 0x949   :  { %2521 = vtanh.f32 %v1384_v38 }
 0x94d   :  { %v2520_v39 = vpop.eup %2519 }
 0x94e   :  { %1291 = vrot.lane.b32.xlu0 %v2520_v39, %s2591_s2 }
 0x953   :  { %v2522_v8 = vpop.eup %2521 }
 0x954   :  { %1387 = vrot.lane.b32.xlu1 %v2522_v8, %s2591_s2 }
 0x9c0   :  { %v1292_v0 = vpop.permute.xlu0 %1291 }
 0x9c1   :  { %v1294_v16 = vmul.f32 %v1292_v0, %v1277_v56 }
 0x9c3   :  { %1296 = vrot.lane.b32.xlu0 %v1294_v16, %s2592_s29 }
 0x9c6   :  { %v1388_v9 = vpop.permute.xlu1 %1387 }
 0x9c7   :  { %v1390_v1 = vmul.f32 %v1388_v9, %v1373_v61 }
 0x9c9   :  { %v1470_v2 = vrot.slane %v1390_v1, %v3074_v21 }
 0x9cb   :  { %1471 = vrot.lane.b32.xlu1 %v1470_v2, %s2592_s29 }
 0xa35   :  { %v1297_v5 = vpop.permute.xlu0 %1296 }
 0xa36   :  { %1299 = vst.msk [vmem:[#allocation4 + $0x2] sm:$0x3] %vm1027_vm4, %v1297_v5  ;;  %2346 = vmatmul.mubr.msk.f32.vlgmr.msra.gmra.mrb[14].mxu1 %vm751_vm3, %v1297_v5 }
 0xa37   :  { %2472 = vmatpush3.bf16.msra.mxu1 %v3052_v3  ;;  %2367 = vmatprep.mubr.msk.f32.mxu1 %vm2588_vm0, %v2587_v52 }
 0xa38   :  { %2473 = vmatprep.subr.bf16.mxu1 %v2589_v36 }
 0xa3b   :  { %2475 = vmatpush3.bf16.msra.mxu1 %v3059_v4 }
 0xa3c   :  { %2482 = vmatprep.subr.bf16.mxu1 %v2589_v36 }
 0xa3d   :  { %v1472_v6 = vpop.permute.xlu1 %1471 }
 0xa3e   :  { %2357 = vmatmul.mubr.msk.f32.vlgmr.msra.gmra.mrb[16].mxu0 %vm751_vm3, %v1472_v6  ;;  %2368 = vmatmul.mubr.msk.f32.vlgmr.msra.gmra.mrb[16].mxu1 %vm751_vm3, %v1472_v6 }
 0xa3f   :  { %2478 = vmatpush3.bf16.msra.mxu0 %v3088_v43  ;;  %2484 = vmatpush3.bf16.msra.mxu1 %v3092_v44  ;;  %v742_v43 = vcombine.high %v3178_v50, %v3178_v50 }
 0xa40   :  { %2479 = vmatprep.subr.bf16.mxu0 %v2589_v36  ;;  %2485 = vmatprep.subr.bf16.mxu1 %v2589_v36 }
 0xa41   :  { %2378 = vmatprep.mubr.msk.f32.mxu0 %vm2588_vm0, %v2587_v52  ;;  %2389 = vmatprep.mubr.msk.f32.mxu1 %vm2588_vm0, %v2587_v52  ;;  %v750_v44 = vadd.f32 %v742_v43, %v3010_v40 }
 0xa43   :  { %2481 = vmatpush3.bf16.msra.mxu0 %v3097_v45  ;;  %2487 = vmatpush3.bf16.msra.mxu1 %v3102_v46 }
 0xb09   :  { %v1459_v3 = vpop.f32.mrb[14].mxu1 }
 0xb0a   :  { %v2347_v4 = vpop.f32.mrb[15].mxu1 }
 0xb11   :  { %v1541_v7 = vpop.f32.mrb[16].mxu0  ;;  %v1637_v10 = vpop.f32.mrb[16].mxu1 }
 0xb12   :  { %v1542_v36 = vadd.f32 %v1541_v7, %v1459_v3  ;;  %v1641_v12 = vadd.f32 %v1637_v10, %v750_v44  ;;  %v2358_v13 = vpop.f32.mrb[17].mxu0  ;;  %v2369_v14 = vpop.f32.mrb[17].mxu1 }
 0xb14   :  { %v1545_v15 = vadd.f32 %v2927_v60, %v1542_v36  ;;  %2523 = vtanh.f32 %v1641_v12 }
 0xb16   :  { %2525 = vtanh.f32 %v1545_v15 }
 0xb1e   :  { %v2524_v52 = vpop.eup %2523 }
 0xb1f   :  { %1647 = vrot.lane.b32.xlu0 %v2524_v52, %s2591_s2  ;;  %v1643_v46 = vmul.f32 0.5, %v2524_v52 }
 0xb20   :  { %v2526_v45 = vpop.eup %2525 }
 0xb21   :  { %1551 = vrot.lane.b32.xlu1 %v2526_v45, %s2591_s2  ;;  %v1547_v17 = vmul.f32 0.5, %v2526_v45  ;;  %v1644_v18 = vadd.f32 0.5, %v1643_v46 }
 0xb23   :  { %v1548_v20 = vadd.f32 0.5, %v1547_v17  ;;  %v1645_v25 = vmul.f32 %v1644_v18, %v1384_v38 }
 0xb25   :  { %v1549_v28 = vmul.f32 %v1548_v20, %v3187_v34 }
 0xb91   :  { %v1648_v40 = vpop.permute.xlu0 %1647 }
 0xb92   :  { %v1650_v19 = vmul.f32 %v1648_v40, %v1644_v18 }
 0xb93   :  { %v1552_v22 = vpop.permute.xlu1 %1551 }
 0xb94   :  { %v1554_v23 = vmul.f32 %v1552_v22, %v1548_v20  ;;  %1652 = vrot.lane.b32.xlu0 %v1650_v19, %s2592_s29 }
 0xb96   :  { %1556 = vrot.lane.b32.xlu1 %v1554_v23, %s2592_s29 }
 0xc06   :  { %v1653_v26 = vpop.permute.xlu0 %1652 }
 0xc07   :  { %v1655_v27 = vadd.f32 %v1653_v26, %v1645_v25 }
 0xc08   :  { %v1557_v29 = vpop.permute.xlu1 %1556 }
 0xc09   :  { %2527 = vtanh.f32 %v1655_v27  ;;  %v1559_v30 = vadd.f32 %v1557_v29, %v1549_v28  ;;  %v1853_v38 = vrot.slane %v1655_v27, %v3074_v21 }
 0xc0b   :  { %2529 = vtanh.f32 %v1559_v30 }
 0xc13   :  { %v2528_v31 = vpop.eup %2527 }
 0xc14   :  { %1658 = vrot.lane.b32.xlu0 %v2528_v31, %s2591_s2 }
 0xc15   :  { %v2530_v47 = vpop.eup %2529 }
 0xc16   :  { %1562 = vrot.lane.b32.xlu1 %v2530_v47, %s2591_s2 }
 0xc86   :  { %v1659_v48 = vpop.permute.xlu0 %1658 }
 0xc87   :  { %v1661_v49 = vmul.f32 %v1659_v48, %v1644_v18 }
 0xc88   :  { %v1563_v50 = vpop.permute.xlu1 %1562 }
 0xc89   :  { %v1741_v41 = vrot.slane %v1661_v49, %v3074_v21  ;;  %v1565_v42 = vmul.f32 %v1563_v50, %v1548_v20 }
 0xc8b   :  { %1567 = vrot.lane.b32.xlu0 %v1565_v42, %s2592_s29  ;;  %1742 = vrot.lane.b32.xlu1 %v1741_v41, %s2592_s29 }
 0xcfd   :  { %v1743_v51 = vpop.permute.xlu1 %1742  ;;  %v1568_v53 = vpop.permute.xlu0 %1567 }
 0xcfe   :  { %1843 = vst.msk [vmem:[#allocation6] sm:$0x3] %vm1027_vm4, %v1743_v51  ;;  %1570 = vst.msk [vmem:[#allocation4 + $0x4] sm:$0x3] %vm1027_vm4, %v1568_v53  ;;  %2379 = vmatmul.mubr.msk.f32.vlgmr.msra.gmra.mrb[18].mxu0 %vm751_vm3, %v1568_v53  ;;  %2390 = vmatmul.mubr.msk.f32.vlgmr.msra.gmra.mrb[18].mxu1 %vm751_vm3, %v1743_v51 }
 0xdd1   :  { %v1730_v54 = vpop.f32.mrb[18].mxu0  ;;  %v1812_v24 = vpop.f32.mrb[18].mxu1 }
 0xdd2   :  { %v1813_v55 = vadd.f32 %v1812_v24, %v1730_v54  ;;  %v2380_v56 = vpop.f32.mrb[19].mxu0  ;;  %v2391_v57 = vpop.f32.mrb[19].mxu1 }
 0xdd4   :  { %v1816_v58 = vadd.f32 %v2927_v60, %v1813_v55 }
 0xdd6   :  { %2531 = vtanh.f32 %v1816_v58 }
 0xde0   :  { %v2532_v59 = vpop.eup %2531 }
 0xde1   :  { %1822 = vrot.lane.b32.xlu0 %v2532_v59, %s2591_s2  ;;  %v1818_v61 = vmul.f32 0.5, %v2532_v59 }
 0xde3   :  { %v1819_v62 = vadd.f32 0.5, %v1818_v61 }
 0xde5   :  { %v1820_v33 = vmul.f32 %v1819_v62, %v1559_v30 }
 0xe53   :  { %v1823_v63 = vpop.permute.xlu0 %1822 }
 0xe54   :  { %v1825_v32 = vmul.f32 %v1823_v63, %v1819_v62 }
 0xe56   :  { %1827 = vrot.lane.b32.xlu1 %v1825_v32, %s2592_s29 }
 0xec8   :  { %v1828_v34 = vpop.permute.xlu1 %1827 }
 0xec9   :  { %v1830_v35 = vadd.f32 %v1828_v34, %v1820_v33 }
 0xecb   :  { %2533 = vtanh.f32 %v1830_v35 }
 0xed5   :  { %v2534_v37 = vpop.eup %2533 }
 0xed6   :  { %1833 = vrot.lane.b32.xlu0 %v2534_v37, %s2591_s2 }
 0xeda   :  { %1854 = vrot.lane.b32.xlu0 %v1853_v38, %s2593_s30 }
 0xf48   :  { %v1834_v60 = vpop.permute.xlu0 %1833 }
 0xf49   :  { %v1836_v39 = vmul.f32 %v1834_v60, %v1819_v62 }
 0xf4b   :  { %1838 = vrot.lane.b32.xlu1 %v1836_v39, %s2592_s29 }
 0xf4c   :  { %v1855_v8 = vpop.permute.xlu0 %1854 }
 0xf4d   :  { %1857 = vst.msk [vmem:[#allocation8] sm:$0x3] %vm1027_vm4, %v1855_v8 }
 0xf4f   :  { %1859 = vrot.lane.b32.xlu1 %v1830_v35, %s2593_s30 }
 0xfbd   :  { %v1839_v0 = vpop.permute.xlu1 %1838 }
 0xfbe   :  { %1841 = vst.msk [vmem:[#allocation4 + $0x6] sm:$0x3] %vm1027_vm4, %v1839_v0  ;;  %1845 = vst.msk [vmem:[#allocation6 + $0x2] sm:$0x3] %vm1027_vm4, %v1839_v0 }
 0xfc1   :  { %v1860_v16 = vpop.permute.xlu1 %1859 }
 0xfc2   :  { %1863 = vst.msk [vmem:[#allocation8 + $0x2] sm:$0x3] %vm1027_vm4, %v1860_v16 }
 0xfc3   :  { %2581 = dma.done.wait [#allocation5 + $0x1], 1024 }
 0xfc4   :  { %2582 = vsyncadd [#allocation5 + $0x1], 4294966272  ;;  %v2594_v21 = vmov 0   ;;  %v1871_v9 = vld [vmem:[#allocation3 + $0x8] sm:$0xff]  ;;  %v1873_v1 = vld [vmem:[#allocation3 + $0x18] sm:$0xff]  ;;  %s2595_s11 = smov [#allocation6]  }
 0xfc5   :  { %1935 = vmatprep.mubr.bf16.mxu0 %v2594_v21  ;;  %1976 = vmatprep.mubr.bf16.mxu1 %v2594_v21  ;;  %v1870_v2 = vld [vmem:[#allocation3] sm:$0xff]  ;;  %v1872_v5 = vld [vmem:[#allocation3 + $0x10] sm:$0xff]  ;;  %v1875_v6 = vld [vmem:[#allocation3 + $0x28] sm:$0xff]  ;;  %s1996_s12 = sshll.u32 %s2595_s11, 4  ;;  %s2596_s7 = smov [#allocation8]   ;;  %s1997_s12 = int_to_ptr.vmem [resolvable:$true] %s1996_s12 }
 0xfc6   :  { %1903 = vmatprep.subr.bf16.mxu0 %v1871_v9  ;;  %1944 = vmatprep.subr.bf16.mxu1 %v1873_v1  ;;  %v1877_v3 = vld [vmem:[#allocation3 + $0x38] sm:$0xff]  ;;  %v1868_v4 = vld [vmem:[#allocation4] sm:$0xff]  ;;  %v1876_v44 = vld [vmem:[#allocation3 + $0x30] sm:$0xff]  ;;  %s2008_s13 = sshll.u32 %s2596_s7, 4  ;;  %s2535_s14 = scalar_lea.vmem %s1997_s12, 64  ;;  %s2009_s13 = int_to_ptr.vmem [resolvable:$true] %s2008_s13 }
 0xfc7   :  { %1904 = vmatpush1.bf16.msra.mxu0 %v1870_v2  ;;  %1945 = vmatpush1.bf16.msra.mxu1 %v1872_v5  ;;  %v1874_v43 = vld [vmem:[#allocation3 + $0x20] sm:$0xff]  ;;  %v1869_v7 = vpack.c.bf16 %v1868_v4, %v1868_v4  ;;  %p2536_p0 = scmp.ne.s32.totalorder %s1997_s12, %s2535_s14  ;;  %p2540_p1 = scmp.lt.s32.totalorder %s1997_s12, %s1997_s12 }
 0xfc8   :  { %1905 = vmatprep.subr.bf16.mxu0 %v1875_v6  ;;  %1946 = vmatprep.subr.bf16.mxu1 %v1877_v3  ;;  %p2541_p2 = scmp.lt.s32.totalorder %s2535_s14, %s2535_s14 }
 0xfca   :  { %p2542_p3 = por %p2541_p2, %p2540_p1 }
 0xfcb   :  { %1906 = vmatpush1.bf16.msra.mxu0 %v1874_v43  ;;  %1947 = vmatpush1.bf16.msra.mxu1 %v1876_v44 }
 0xfcc   :  { %p2543_p4 = pnand %p2542_p3, %p2536_p0 }
 0xfce   :  { %2082 = vmatmul.mubr.msk.bf16.vlgmr.msra.gmra.mrb[20].mxu0 %vm751_vm3, %v1869_v7  ;;  %2083 = vmatmul.mubr.msk.bf16.vlgmr.msra.gmra.mrb[20].mxu1 %vm751_vm3, %v1869_v7 }
 0xfcf   :  { %2546 = shalt.err (!%p2543_p4)
}
 0xfd0   :  { %s2547_s17 = scalar_lea.hbm %s3302_s9, 64 }
 0xfd1   :  { %p2548_p5 = scmp.ne.s32.totalorder %s3302_s9, %s2547_s17  ;;  %p2551_p6 = scmp.lt.u32.totalorder %s2547_s17, %s3302_s9 }
 0xfd3   :  { %p2553_p7 = pnand %p2551_p6, %p2548_p5 }
 0xfd5   :  { %2556 = shalt.err (!%p2553_p7)
}
 0xfd6   :  { %s2597_s0 = smov 2   ;;  %s2557_s23 = scalar_lea.vmem %s2009_s13, 64 }
 0xfd7   :  { %2002 = dma.vmem_to_hbm [thread:$0]  %s1997_s12, 64, %s3302_s9, [#allocation7], %s2592_s29, %s2592_s29, %s2597_s0  }
 0xfd8   :  { %p2558_p8 = scmp.ne.s32.totalorder %s2009_s13, %s2557_s23  ;;  %p2562_p9 = scmp.lt.s32.totalorder %s2009_s13, %s2009_s13 }
 0xfd9   :  { %p2563_p10 = scmp.lt.s32.totalorder %s2557_s23, %s2557_s23 }
 0xfdb   :  { %p2564_p11 = por %p2563_p10, %p2562_p9 }
 0xfdd   :  { %p2565_p12 = pnand %p2564_p11, %p2558_p8 }
 0xfdf   :  { %2568 = shalt.err (!%p2565_p12)
}
 0xfe0   :  { %s2569_s25 = scalar_lea.hbm %s3303_s10, 64 }
 0xfe1   :  { %p2570_p13 = scmp.ne.s32.totalorder %s3303_s10, %s2569_s25  ;;  %p2573_p0 = scmp.lt.u32.totalorder %s2569_s25, %s3303_s10 }
 0xfe3   :  { %p2575_p1 = pnand %p2573_p0, %p2570_p13 }
 0xfe5   :  { %2578 = shalt.err (!%p2575_p1)
}
 0xfe6   :  { %2014 = dma.vmem_to_hbm [thread:$0]  %s2009_s13, 64, %s3303_s10, [#allocation9], %s2592_s29, %s2592_s29, %s2597_s0   ;;  %v1882_v10 = vsub.s32 0, %v3071_v11  ;;  %v1890_v36 = vsub.s32 2, %v3071_v11  ;;  %v1886_v13 = vsub.s32 1, %v3071_v11  ;;  %v1894_v14 = vsub.s32 3, %v3071_v11 }
 0xfe7   :  { %v1878_v12 = vld [vmem:[%s3298_s5] sm:$0xf] }
 0xfe8   :  { %v1883_v15 = vrot.slane %v1878_v12, %v1882_v10  ;;  %v1891_v52 = vrot.slane %v1878_v12, %v1890_v36  ;;  %v1887_v45 = vrot.slane %v1878_v12, %v1886_v13  ;;  %v1895_v46 = vrot.slane %v1878_v12, %v1894_v14 }
0x10a1   :  { %v1937_v17 = vpop.f32.mrb[20].mxu0  ;;  %v1978_v18 = vpop.f32.mrb[20].mxu1 }
0x10a2   :  { %v1938_v40 = vadd.f32 %v1937_v17, %v1883_v15  ;;  %v1979_v19 = vadd.f32 %v1978_v18, %v1891_v52  ;;  %v1939_v20 = vpop.f32.mrb[21].mxu0  ;;  %v1980_v22 = vpop.f32.mrb[21].mxu1 }
0x10a3   :  { %v1940_v23 = vadd.f32 %v1939_v20, %v1887_v45  ;;  %v1981_v25 = vadd.f32 %v1980_v22, %v1895_v46  ;;  %v1941_v26 = vpop.f32.mrb[22].mxu0  ;;  %v1982_v27 = vpop.f32.mrb[22].mxu1 }
0x10a4   :  { %1985 = vst [vmem:[%s3301_s8] sm:$0xff] %v1938_v40  ;;  %1987 = vst [vmem:[%s3301_s8 + $0x10] sm:$0xff] %v1979_v19  ;;  %v1942_v11 = vpop.f32.mrb[23].mxu0  ;;  %v1983_v28 = vpop.f32.mrb[23].mxu1 }
0x10a5   :  { %1986 = vst [vmem:[%s3301_s8 + $0x8] sm:$0xff] %v1940_v23  ;;  %1988 = vst [vmem:[%s3301_s8 + $0x18] sm:$0xff] %v1981_v25 }
0x10a6   :  { %2583 = dma.done.wait [#allocation7], 64  }
0x10a7   :  { %2584 = vsyncadd [#allocation7], 4294967232 }
0x10a8   :  { %2585 = dma.done.wait [#allocation9], 64  }
0x10a9   :  { %2586 = vsyncadd [#allocation9], 4294967232 }
0x10aa   :  { %2023 = vsyncpa [#allocation7], 1 }
0x10ab   :  { %2024 = vsyncpa [#allocation9], 1 }
0x10ac   :  { %2025 = vsyncmov [#allocation5] }
0x10af   :  { %s2026_s15 = vpop.sfrf %2025 }
0x10b0   :  { %p2084_p2 = scmp.ne.s32.totalorder %s2026_s15, 0 }
0x10b2   :  { %2030 = shalt.err (%p2084_p2)  }
0x10b3   :  { %2032 = vsyncmov [#allocation5 + $0x1] }
0x10b6   :  { %s2033_s16 = vpop.sfrf %2032 }
0x10b7   :  { %p2085_p3 = scmp.ne.s32.totalorder %s2033_s16, 0 }
0x10b9   :  { %2037 = shalt.err (%p2085_p3)  }

</bundles_post_ra>
